<compile_context>
chip_gen: v6e
topology: v6e:2x2x1
jax: 0.10.0
libtpu: 0.0.40
codegen_flags: <defaults>
</compile_context>

<pallas_src>
import functools

import jax
import jax.numpy as jnp
from jax.experimental import pallas as pl
from jax.experimental.pallas import tpu as pltpu

LN_EPS = 1e-5  # PyTorch nn.LayerNorm default


def _ffn_kernel(x_ref, w1_ref, w2_ref, p_ref, o_ref, *, d_model):
    # Packed parameter slab (f32): row 0 = b1 (d_ff lanes); rows 1..5 = b2, g1, be1, g2, be2
    # (first d_model lanes). Hoisted once per grid step; each row broadcasts over the tile rows.
    p = p_ref[...]
    b1 = p[0:1, :]
    b2 = p[1:2, :d_model]
    g1 = p[2:3, :d_model]
    be1 = p[3:4, :d_model]
    g2 = p[4:5, :d_model]
    be2 = p[5:6, :d_model]

    x = x_ref[...].astype(jnp.float32)            # bf16 HBM tile -> f32 for LayerNorm math

    # ---- LayerNorm 1 (f32) ----
    mu = jnp.mean(x, axis=-1, keepdims=True)
    xc = x - mu
    var = jnp.mean(xc * xc, axis=-1, keepdims=True)
    h = xc * jax.lax.rsqrt(var + LN_EPS) * g1 + be1       # normalized src (residual base)

    # ---- Linear1 -> ReLU (bf16 MXU operands, f32 accumulation) ----
    z = jnp.dot(h.astype(jnp.bfloat16), w1_ref[...],
                preferred_element_type=jnp.float32) + b1
    z = jnp.maximum(z, 0.0)

    # ---- (Dropout = identity in eval) -> Linear2 ----
    y = jnp.dot(z.astype(jnp.bfloat16), w2_ref[...],
                preferred_element_type=jnp.float32) + b2

    # ---- Residual onto normalized src, then LayerNorm 2 ----
    s = h + y
    mu2 = jnp.mean(s, axis=-1, keepdims=True)
    sc = s - mu2
    var2 = jnp.mean(sc * sc, axis=-1, keepdims=True)
    o_ref[...] = (sc * jax.lax.rsqrt(var2 + LN_EPS) * g2 + be2).astype(o_ref.dtype)


def _choose_tm(n_rows, tm_max):
    """Row tile: as large as possible (HBM roofline), multiple of 128 (MXU-aligned), but keep
    the grid >=2 steps (v7x's two TensorCores share the grid) and prefer >=8 steps."""
    tm = max(128, (min(int(tm_max), 1024) // 128) * 128)
    while tm > 256 and pl.cdiv(n_rows, tm) < 8:   # >= 4 steps per v7x core when cheap
        tm //= 2
    while tm > 128 and pl.cdiv(n_rows, tm) < 2:   # both v7x cores must get work
        tm //= 2
    return tm


def _vmem_limit_bytes(tm, d_model, d_ff):
    need = (2 * 2 * tm * d_model * 2          # x + out tiles, double-buffered, bf16
            + 2 * 2 * d_model * d_ff * 2      # W1 + W2, double-buffered, bf16
            + 2 * 8 * d_ff * 4                # packed param slab, double-buffered, f32
            + 2 * tm * d_ff * 4               # z intermediate (+ cast slack), f32
            + 6 * tm * d_model * 4)           # h / y / s intermediates (+ slack), f32
    try:
        cap = int(pltpu.get_tpu_info().vmem_capacity_bytes)  # 128 MiB v5e/v6e, 64 MiB v7x
    except Exception:
        cap = 64 << 20
    # Request at most 75% of physical VMEM (headroom for compiler scratch / semaphores):
    # ~48 MiB on v7x, ~96 MiB on v5e/v6e.  Floor at the 32 MiB scoped default.
    return int(min(max(need * 2, 32 << 20), (cap * 3) // 4))


@functools.partial(jax.jit, static_argnames=("tm_max",))
def positionwise_ffn(x, w1, b1, w2, b2, g1, be1, g2, be2, *, tm_max=1024):
    """x: (B, S, d_model), any float dtype (cast to bf16 at the HBM boundary).
    Linear weights are stored transposed vs. torch so the kernel computes x @ W.
    Returns (B, S, d_model) bf16."""
    B, S, D = x.shape
    d_ff = w1.shape[1]
    assert d_ff >= D and D % 128 == 0 and d_ff % 128 == 0, "feature dims must be lane-dense"
    N = B * S
    tm = _choose_tm(N, tm_max)

    # bf16 activations + weights at the HBM boundary (memory-bound kernel).
    x2 = x.reshape(N, D).astype(jnp.bfloat16)
    w1b = w1.astype(jnp.bfloat16)
    w2b = w2.astype(jnp.bfloat16)

    # Pack biases + LayerNorm params into a single (8, d_ff) f32 slab (one DMA, not five).
    def _row(v):
        v = v.astype(jnp.float32).reshape(1, -1)
        return jnp.pad(v, ((0, 0), (0, d_ff - v.shape[1])))
    params = jnp.concatenate(
        [_row(b1), _row(b2), _row(g1), _row(be1), _row(g2), _row(be2),
         jnp.zeros((2, d_ff), jnp.float32)], axis=0)

    grid = (pl.cdiv(N, tm),)   # ragged last block: reads padded, writes masked by Pallas
    full = lambda i: (0, 0)

    flops = 4 * N * D * d_ff                                   # two matmuls
    bytes_accessed = (2 * N * D * 2                            # bf16 x in + out
                      + 2 * D * d_ff * 2                       # bf16 weights
                      + 8 * d_ff * 4)                          # packed params

    out = pl.pallas_call(
        functools.partial(_ffn_kernel, d_model=D),
        out_shape=jax.ShapeDtypeStruct((N, D), jnp.bfloat16),
        grid_spec=pltpu.PrefetchScalarGridSpec(
            num_scalar_prefetch=0,
            grid=grid,
            in_specs=[
                pl.BlockSpec((tm, D), lambda i: (i, 0)),       # x rows (bf16)
                pl.BlockSpec((D, d_ff), full),                 # W1 (bf16, resident)
                pl.BlockSpec((d_ff, D), full),                 # W2 (bf16, resident)
                pl.BlockSpec((8, d_ff), full),                 # packed b1/b2/g1/be1/g2/be2
            ],
            out_specs=pl.BlockSpec((tm, D), lambda i: (i, 0)),
        ),
        compiler_params=pltpu.CompilerParams(
            dimension_semantics=("parallel",),                 # row axis -> v7x's 2 TCs
            vmem_limit_bytes=_vmem_limit_bytes(tm, D, d_ff)),
        cost_estimate=pl.CostEstimate(
            flops=flops, transcendentals=2 * N, bytes_accessed=bytes_accessed),
    )(x2, w1b, w2b, params)
    return out.reshape(B, S, D)


def _reference(x_bf16, w1, b1, w2, b2, g1, be1, g2, be2):
    """Pure-JAX reference mirroring the kernel's precision boundaries
    (bf16 activation I/O, bf16 matmul operands, f32 accumulation / LayerNorm)."""
    x = x_bf16.astype(jnp.float32)

    def ln(v, g, b):
        mu = jnp.mean(v, axis=-1, keepdims=True)
        var = jnp.mean((v - mu) ** 2, axis=-1, keepdims=True)
        return (v - mu) * jax.lax.rsqrt(var + LN_EPS) * g + b

    h = ln(x, g1, be1)
    z = jnp.maximum(
        jnp.dot(h.astype(jnp.bfloat16), w1.astype(jnp.bfloat16),
                preferred_element_type=jnp.float32) + b1, 0.0)
    y = jnp.dot(z.astype(jnp.bfloat16), w2.astype(jnp.bfloat16),
                preferred_element_type=jnp.float32) + b2
    return ln(h + y, g2, be2).astype(jnp.bfloat16)


if __name__ == "__main__":
    # Lane-dense feature dims; N = 400 rows -> tm = 256, grid of 2 steps, with a ragged
    # (masked) final block to exercise the no-pad path.
    d_model, d_ff = 128, 256
    B, S = 4, 100

    key = jax.random.PRNGKey(0)
    kx, k1, k2, k3, k4 = jax.random.split(key, 5)

    x = jax.random.normal(kx, (B, S, d_model), dtype=jnp.float32).astype(jnp.bfloat16)
    # Linear weights stored transposed relative to torch (so the kernel does x @ W).
    w1 = jax.random.normal(k1, (d_model, d_ff), dtype=jnp.float32) * 0.05
    b1 = jax.random.normal(k2, (d_ff,), dtype=jnp.float32) * 0.05
    w2 = jax.random.normal(k3, (d_ff, d_model), dtype=jnp.float32) * 0.05
    b2 = jax.random.normal(k4, (d_model,), dtype=jnp.float32) * 0.05
    # LayerNorm params: PyTorch default init (gamma=1, beta=0).
    g1 = jnp.ones((d_model,), jnp.float32)
    be1 = jnp.zeros((d_model,), jnp.float32)
    g2 = jnp.ones((d_model,), jnp.float32)
    be2 = jnp.zeros((d_model,), jnp.float32)

    out = positionwise_ffn(x, w1, b1, w2, b2, g1, be1, g2, be2)
    out = jax.block_until_ready(out)
    assert out.shape == (B, S, d_model) and out.dtype == jnp.bfloat16

    ref = _reference(x, w1, b1, w2, b2, g1, be1, g2, be2)
    out_f = out.astype(jnp.float32)
    ref_f = ref.astype(jnp.float32)
    max_err = float(jnp.max(jnp.abs(out_f - ref_f)))
    assert bool(jnp.all(jnp.isfinite(out_f))), "NaN/Inf leaked from the masked ragged block"
    assert jnp.allclose(out_f, ref_f, atol=2e-2, rtol=2e-2), max_err
    print("KERNEL_OK")
</pallas_src>

<mosaic_0001>
module attributes {stable_mosaic.version = 11 : i64} {
  func.func @_ffn_kernel(%arg0: i32, %arg1: memref<256x128xbf16, #tpu.memory_space<vmem>>, %arg2: memref<128x256xbf16, #tpu.memory_space<vmem>>, %arg3: memref<256x128xbf16, #tpu.memory_space<vmem>>, %arg4: memref<8x256xf32, #tpu.memory_space<vmem>>, %arg5: memref<256x128xbf16, #tpu.memory_space<vmem>>) attributes {dimension_semantics = [#tpu.dimension_semantics<parallel>], iteration_bounds = array<i64: 2>, scalar_prefetch = 0 : i64, scratch_operands = 0 : i64, tpu.core_type = #tpu.core_type<tc>, window_params = [{transform_indices = @transform_0, window_bounds = array<i64: 256, 128>}, {pipeline_mode = #tpu.pipeline_mode<synchronous>, transform_indices = @transform_1, window_bounds = array<i64: 128, 256>}, {pipeline_mode = #tpu.pipeline_mode<synchronous>, transform_indices = @transform_2, window_bounds = array<i64: 256, 128>}, {pipeline_mode = #tpu.pipeline_mode<synchronous>, transform_indices = @transform_3, window_bounds = array<i64: 8, 256>}, {transform_indices = @transform_4, window_bounds = array<i64: 256, 128>}]} {
    %c0 = arith.constant 0 : index
    %c0_0 = arith.constant 0 : index
    %0 = vector.load %arg4[%c0, %c0_0] : memref<8x256xf32, #tpu.memory_space<vmem>>, vector<8x256xf32>
    %1 = vector.extract_strided_slice %0 {offsets = [0, 0], sizes = [1, 256], strides = [1, 1]} : vector<8x256xf32> to vector<1x256xf32>
    %2 = vector.extract_strided_slice %0 {offsets = [1, 0], sizes = [1, 128], strides = [1, 1]} : vector<8x256xf32> to vector<1x128xf32>
    %3 = vector.extract_strided_slice %0 {offsets = [2, 0], sizes = [1, 128], strides = [1, 1]} : vector<8x256xf32> to vector<1x128xf32>
    %4 = vector.extract_strided_slice %0 {offsets = [3, 0], sizes = [1, 128], strides = [1, 1]} : vector<8x256xf32> to vector<1x128xf32>
    %5 = vector.extract_strided_slice %0 {offsets = [4, 0], sizes = [1, 128], strides = [1, 1]} : vector<8x256xf32> to vector<1x128xf32>
    %6 = vector.extract_strided_slice %0 {offsets = [5, 0], sizes = [1, 128], strides = [1, 1]} : vector<8x256xf32> to vector<1x128xf32>
    %c0_1 = arith.constant 0 : index
    %c0_2 = arith.constant 0 : index
    %7 = vector.load %arg1[%c0_1, %c0_2] : memref<256x128xbf16, #tpu.memory_space<vmem>>, vector<256x128xbf16>
    %8 = arith.extf %7 : vector<256x128xbf16> to vector<256x128xf32>
    %cst = arith.constant dense<0.000000e+00> : vector<256xf32>
    %9 = vector.multi_reduction <add>, %8, %cst [1] : vector<256x128xf32> to vector<256xf32>
    %10 = vector.shape_cast %9 : vector<256xf32> to vector<256x1xf32>
    %cst_3 = arith.constant 1.280000e+02 : f32
    %11 = vector.broadcast %cst_3 : f32 to vector<256x1xf32>
    %12 = arith.divf %10, %11 : vector<256x1xf32>
    %13 = vector.broadcast %12 : vector<256x1xf32> to vector<256x128xf32>
    %14 = arith.subf %8, %13 : vector<256x128xf32>
    %15 = arith.mulf %14, %14 : vector<256x128xf32>
    %cst_4 = arith.constant dense<0.000000e+00> : vector<256xf32>
    %16 = vector.multi_reduction <add>, %15, %cst_4 [1] : vector<256x128xf32> to vector<256xf32>
    %17 = vector.shape_cast %16 : vector<256xf32> to vector<256x1xf32>
    %cst_5 = arith.constant 1.280000e+02 : f32
    %18 = vector.broadcast %cst_5 : f32 to vector<256x1xf32>
    %19 = arith.divf %17, %18 : vector<256x1xf32>
    %cst_6 = arith.constant 9.99999974E-6 : f32
    %20 = vector.broadcast %cst_6 : f32 to vector<256x1xf32>
    %21 = arith.addf %19, %20 : vector<256x1xf32>
    %22 = math.rsqrt %21 : vector<256x1xf32>
    %23 = vector.broadcast %22 : vector<256x1xf32> to vector<256x128xf32>
    %24 = arith.mulf %14, %23 : vector<256x128xf32>
    %25 = vector.broadcast %3 : vector<1x128xf32> to vector<256x128xf32>
    %26 = arith.mulf %24, %25 : vector<256x128xf32>
    %27 = vector.broadcast %4 : vector<1x128xf32> to vector<256x128xf32>
    %28 = arith.addf %26, %27 : vector<256x128xf32>
    %29 = arith.truncf %28 : vector<256x128xf32> to vector<256x128xbf16>
    %c0_7 = arith.constant 0 : index
    %c0_8 = arith.constant 0 : index
    %30 = vector.load %arg2[%c0_7, %c0_8] : memref<128x256xbf16, #tpu.memory_space<vmem>>, vector<128x256xbf16>
    %cst_9 = arith.constant dense<0.000000e+00> : vector<256x256xf32>
    %31 = tpu.matmul %29, %30, %cst_9 {dimension_numbers = #tpu.dot_dimension_numbers<[1], [0], [0], [1], [0, 0, 1, 1], [], []>} : vector<256x128xbf16>, vector<128x256xbf16>, vector<256x256xf32> -> vector<256x256xf32>
    %32 = vector.broadcast %1 : vector<1x256xf32> to vector<256x256xf32>
    %33 = arith.addf %31, %32 : vector<256x256xf32>
    %cst_10 = arith.constant 0.000000e+00 : f32
    %34 = vector.broadcast %cst_10 : f32 to vector<256x256xf32>
    %35 = arith.maximumf %33, %34 : vector<256x256xf32>
    %36 = arith.truncf %35 : vector<256x256xf32> to vector<256x256xbf16>
    %c0_11 = arith.constant 0 : index
    %c0_12 = arith.constant 0 : index
    %37 = vector.load %arg3[%c0_11, %c0_12] : memref<256x128xbf16, #tpu.memory_space<vmem>>, vector<256x128xbf16>
    %cst_13 = arith.constant dense<0.000000e+00> : vector<256x128xf32>
    %38 = tpu.matmul %36, %37, %cst_13 {dimension_numbers = #tpu.dot_dimension_numbers<[1], [0], [0], [1], [0, 0, 1, 1], [], []>} : vector<256x256xbf16>, vector<256x128xbf16>, vector<256x128xf32> -> vector<256x128xf32>
    %39 = vector.broadcast %2 : vector<1x128xf32> to vector<256x128xf32>
    %40 = arith.addf %38, %39 : vector<256x128xf32>
    %41 = arith.addf %28, %40 : vector<256x128xf32>
    %cst_14 = arith.constant dense<0.000000e+00> : vector<256xf32>
    %42 = vector.multi_reduction <add>, %41, %cst_14 [1] : vector<256x128xf32> to vector<256xf32>
    %43 = vector.shape_cast %42 : vector<256xf32> to vector<256x1xf32>
    %cst_15 = arith.constant 1.280000e+02 : f32
    %44 = vector.broadcast %cst_15 : f32 to vector<256x1xf32>
    %45 = arith.divf %43, %44 : vector<256x1xf32>
    %46 = vector.broadcast %45 : vector<256x1xf32> to vector<256x128xf32>
    %47 = arith.subf %41, %46 : vector<256x128xf32>
    %48 = arith.mulf %47, %47 : vector<256x128xf32>
    %cst_16 = arith.constant dense<0.000000e+00> : vector<256xf32>
    %49 = vector.multi_reduction <add>, %48, %cst_16 [1] : vector<256x128xf32> to vector<256xf32>
    %50 = vector.shape_cast %49 : vector<256xf32> to vector<256x1xf32>
    %cst_17 = arith.constant 1.280000e+02 : f32
    %51 = vector.broadcast %cst_17 : f32 to vector<256x1xf32>
    %52 = arith.divf %50, %51 : vector<256x1xf32>
    %cst_18 = arith.constant 9.99999974E-6 : f32
    %53 = vector.broadcast %cst_18 : f32 to vector<256x1xf32>
    %54 = arith.addf %52, %53 : vector<256x1xf32>
    %55 = math.rsqrt %54 : vector<256x1xf32>
    %56 = vector.broadcast %55 : vector<256x1xf32> to vector<256x128xf32>
    %57 = arith.mulf %47, %56 : vector<256x128xf32>
    %58 = vector.broadcast %5 : vector<1x128xf32> to vector<256x128xf32>
    %59 = arith.mulf %57, %58 : vector<256x128xf32>
    %60 = vector.broadcast %6 : vector<1x128xf32> to vector<256x128xf32>
    %61 = arith.addf %59, %60 : vector<256x128xf32>
    %62 = arith.truncf %61 : vector<256x128xf32> to vector<256x128xbf16>
    %c0_19 = arith.constant 0 : index
    %c0_20 = arith.constant 0 : index
    %63 = vector.load %arg5[%c0_19, %c0_20] : memref<256x128xbf16, #tpu.memory_space<vmem>>, vector<256x128xbf16>
    tpu.vector_store %arg5[%c0_19, %c0_20], %62 {strides = array<i32>} : memref<256x128xbf16, #tpu.memory_space<vmem>>, vector<256x128xbf16>,
    return
  }
  func.func @transform_0(%arg0: i32) -> (i32, i32) {
    %c0_i32 = arith.constant 0 : i32
    %c0_i32_0 = arith.constant 0 : i32
    return %arg0, %c0_i32 : i32, i32
  }
  func.func @transform_1(%arg0: i32) -> (i32, i32) {
    %c0_i32 = arith.constant 0 : i32
    %c0_i32_0 = arith.constant 0 : i32
    %c0_i32_1 = arith.constant 0 : i32
    return %c0_i32, %c0_i32_0 : i32, i32
  }
  func.func @transform_2(%arg0: i32) -> (i32, i32) {
    %c0_i32 = arith.constant 0 : i32
    %c0_i32_0 = arith.constant 0 : i32
    %c0_i32_1 = arith.constant 0 : i32
    return %c0_i32, %c0_i32_0 : i32, i32
  }
  func.func @transform_3(%arg0: i32) -> (i32, i32) {
    %c0_i32 = arith.constant 0 : i32
    %c0_i32_0 = arith.constant 0 : i32
    %c0_i32_1 = arith.constant 0 : i32
    return %c0_i32, %c0_i32_0 : i32, i32
  }
  func.func @transform_4(%arg0: i32) -> (i32, i32) {
    %c0_i32 = arith.constant 0 : i32
    %c0_i32_0 = arith.constant 0 : i32
    return %arg0, %c0_i32 : i32, i32
  }
}

</mosaic_0001>

<bundles_post_ra>
// kernel: positionwise_ffn.1
= control target key start
LH: loop header
LB: loop body
LE: loop exit
PB: predicated region body
PF: predicated region fallthrough
CT: control target
= control target key end

     0   :  { %s3150_s15 = smov 0   ;;  %s3152_s16 = smov 0   ;;  %s4496_s0 = inlined_call_operand.vmem [shape: bf16[400,128], index: 0, kind: input, shape index: {}]   ;;  %s4497_s1 = inlined_call_operand.vmem [shape: bf16[128,256], index: 1, kind: input, shape index: {}]   ;;  %s4498_s2 = inlined_call_operand.vmem [shape: bf16[256,128], index: 2, kind: input, shape index: {}]   ;;  %s4499_s3 = inlined_call_operand.vmem [shape: f32[8,256], index: 3, kind: input, shape index: {}]   ;;  %s4500_s4 = inlined_call_operand.vmem [shape: bf16[400,128], index: 4, kind: output, shape index: {}]  }
   0x1   :  { %s3154_s17 = smov 0  }
   0x2 LB: > { %s3163_s18 = sadd.s32 4294967295, %s3090_s17   ;;  %s3165_s19 = sadd.s32 1, %s3090_s17   ;;  %s3090_s17 = sphi %s3154_s17, %s4507_s17   ;;  %s3086_s16 = sphi %s3152_s16, %s4506_s16   ;;  %s3082_s15 = sphi %s3150_s15, %s4505_s15  }
   0x3   : > { %s107_s20 = ssub.s32 %s3090_s17, %s3165_s19  ;;  %s110_s21 = sadd.s32 1, %s3086_s16 }
   0x4   : > { %p108_p0 = scmp.eq.s32.totalorder %s107_s20, 0  ;;  %p120_p1 = scmp.ne.s32.totalorder %s3086_s16, %s3082_s15 }
   0x5   : > { %p121_p2 = scmp.eq.s32.totalorder %s3163_s18, 1  ;;  %p2372_p3 = scmp.ge.s32.totalorder %s3090_s17, 1 }
   0x6   : > { %s3173_s22 = scalar_select %p108_p0, %s3086_s16, %s110_s21  }
   0x7   : > { %p3175_p4 = por %p121_p2, %p120_p1  ;;  %p171_p5 = scmp.lt.s32.totalorder %s3090_s17, 3 }
   0x9   : > { %p172_p6 = pnand %p2372_p3, %p171_p5 }
   0xa   : > { %s3180_s24 = sshll.u32 (!%p172_p6), %s3163_s18, 5 }
   0xb   : > { %175 = sbr.rel (%p172_p6) target bundleno = 1303 (0x517), region = 36  ;;  %p205_p7 = scmp.lt.s32.totalorder (!%p172_p6), %s3180_s24, 49 }
  0x10   : > { %s206_s25 = scalar_select %p205_p7, %s3180_s24, 49  ;;  %v2867_v30 = vld [vmem:[%s4497_s1 + $0x74] ss:$8 sps:$4 sm:$0xff]   ;;  %v2869_v31 = vld [vmem:[%s4497_s1 + $0x70] ss:$8 sps:$4 sm:$0xff]  }
  0x11   : > { %831 = vmatprep.subr.bf16.mxu0 %v2867_v30  ;;  %v2870_v59 = vld [vmem:[%s4497_s1 + $0x64] ss:$8 sps:$4 sm:$0xff]   ;;  %v2872_v60 = vld [vmem:[%s4497_s1 + $0x60] ss:$8 sps:$4 sm:$0xff]   ;;  %s2489_s27 = sshll.u32 (%p3175_p4), %s3163_s18, 7 }
  0x12   : > { %s2375_s26 = sshll.u32 %s206_s25, 2  ;;  %832 = vmatpush1.bf16.msra.mxu0 %v2869_v31  ;;  %v2876_v31 = vld [vmem:[%s4497_s1 + $0x44] ss:$8 sps:$4 sm:$0xff]   ;;  %s4368_s5 = scalar_lea.vmem (%p3175_p4), %s4500_s4, %s2489_s27  }
  0x13   : > { %s3187_s29 = scalar_lea.vmem %s4496_s0, %s2375_s26  ;;  %833 = vmatprep.subr.bf16.mxu0 %v2870_v59  ;;  %s2037_s26 = ssub.s32 (%p3175_p4), 50, %s3180_s24 }
  0x14   : > { %v3190_v0 = vld [vmem:[%s3187_s29] sm:$0xff]   ;;  %v3193_v1 = vld [vmem:[%s3187_s29 + $0x8] sm:$0xff]   ;;  %v3202_v6 = vld [vmem:[%s3187_s29 + $0x10] sm:$0xff]   ;;  %p2038_p8 = scmp.lt.s32.totalorder (%p3175_p4), %s2037_s26, 32 }
  0x15   : > { %v2494_v2 = vunpack.c.l.bf16 %v3190_v0  ;;  %v2498_v3 = vunpack.c.l.bf16 %v3193_v1  ;;  %v2495_v4 = vunpack.c.h.bf16 %v3190_v0  ;;  %v2499_v5 = vunpack.c.h.bf16 %v3193_v1  ;;  %v3205_v7 = vld [vmem:[%s3187_s29 + $0x18] sm:$0xff]   ;;  %v3218_v12 = vld [vmem:[%s3187_s29 + $0x20] sm:$0xff]   ;;  %v3227_v15 = vld [vmem:[%s3187_s29 + $0x28] sm:$0xff]  }
  0x16   : > { %v2502_v8 = vunpack.c.l.bf16 %v3202_v6  ;;  %v2503_v9 = vunpack.c.h.bf16 %v3202_v6  ;;  %v2506_v10 = vunpack.c.l.bf16 %v3205_v7  ;;  %v2507_v11 = vunpack.c.h.bf16 %v3205_v7  ;;  %v3236_v18 = vld [vmem:[%s3187_s29 + $0x30] sm:$0xff]   ;;  %v3245_v21 = vld [vmem:[%s3187_s29 + $0x38] sm:$0xff]   ;;  %v3254_v24 = vld [vmem:[%s3187_s29 + $0x40] sm:$0xff]   ;;  %834 = vmatpush1.bf16.msra.mxu0 %v2872_v60 }
  0x17   : > { %286 = vadd.xlane.f32.xlu0 %v2494_v2  ;;  %290 = vadd.xlane.f32.xlu1 %v2498_v3  ;;  %v2510_v13 = vunpack.c.l.bf16 %v3218_v12  ;;  %v2511_v14 = vunpack.c.h.bf16 %v3218_v12  ;;  %v2514_v16 = vunpack.c.l.bf16 %v3227_v15  ;;  %v2515_v17 = vunpack.c.h.bf16 %v3227_v15  ;;  %v3263_v27 = vld [vmem:[%s3187_s29 + $0x48] sm:$0xff]   ;;  %v3284_v38 = vld [vmem:[%s3187_s29 + $0x50] sm:$0xff]   ;;  %v3307_v52 = vld [vmem:[%s3187_s29 + $0x58] sm:$0xff]  }
  0x18   : > { %v2518_v19 = vunpack.c.l.bf16 %v3236_v18  ;;  %v2519_v20 = vunpack.c.h.bf16 %v3236_v18  ;;  %v2522_v22 = vunpack.c.l.bf16 %v3245_v21  ;;  %v2523_v23 = vunpack.c.h.bf16 %v3245_v21  ;;  %v3334_v1 = vld [vmem:[%s3187_s29 + $0x60] sm:$0xff]   ;;  %v3400_v60 = vld [vmem:[%s3187_s29 + $0x70] sm:$0xff]  }
  0x19   : > { %v2526_v25 = vunpack.c.l.bf16 %v3254_v24  ;;  %v2527_v26 = vunpack.c.h.bf16 %v3254_v24  ;;  %v2530_v28 = vunpack.c.l.bf16 %v3263_v27  ;;  %v2531_v29 = vunpack.c.h.bf16 %v3263_v27 }
  0x1a   : > { %v2534_v42 = vunpack.c.l.bf16 %v3284_v38  ;;  %v2535_v49 = vunpack.c.h.bf16 %v3284_v38  ;;  %v2538_v54 = vunpack.c.l.bf16 %v3307_v52  ;;  %v2539_v61 = vunpack.c.h.bf16 %v3307_v52 }
  0x1b   : > { %288 = vadd.xlane.f32.xlu0 %v2495_v4  ;;  %292 = vadd.xlane.f32.xlu1 %v2499_v5  ;;  %v2542_v6 = vunpack.c.l.bf16 %v3334_v1 }
  0x1f   : > { %294 = vadd.xlane.f32.xlu0 %v2502_v8  ;;  %296 = vadd.xlane.f32.xlu1 %v2503_v9 }
  0x23   : > { %298 = vadd.xlane.f32.xlu0 %v2506_v10  ;;  %300 = vadd.xlane.f32.xlu1 %v2507_v11 }
  0x27   : > { %302 = vadd.xlane.f32.xlu0 %v2510_v13  ;;  %304 = vadd.xlane.f32.xlu1 %v2511_v14 }
  0x2b   : > { %306 = vadd.xlane.f32.xlu0 %v2514_v16  ;;  %308 = vadd.xlane.f32.xlu1 %v2515_v17 }
  0x2f   : > { %310 = vadd.xlane.f32.xlu0 %v2518_v19  ;;  %312 = vadd.xlane.f32.xlu1 %v2519_v20 }
  0x33   : > { %314 = vadd.xlane.f32.xlu0 %v2522_v22  ;;  %316 = vadd.xlane.f32.xlu1 %v2523_v23 }
  0x37   : > { %318 = vadd.xlane.f32.xlu0 %v2526_v25  ;;  %320 = vadd.xlane.f32.xlu1 %v2527_v26 }
  0x3b   : > { %322 = vadd.xlane.f32.xlu0 %v2530_v28  ;;  %324 = vadd.xlane.f32.xlu1 %v2531_v29 }
  0xa0   : > { %v287_v32 = vpop.xlane.xlu0 %286  ;;  %v291_v33 = vpop.xlane.xlu1 %290 }
  0xa1   : > { %v351_v34 = vmul.f32 0.0078125, %v287_v32  ;;  %v353_v36 = vmul.f32 0.0078125, %v291_v33  ;;  %v2878_v32 = vld [vmem:[%s4497_s1 + $0x40] ss:$8 sps:$4 sm:$0xff]   ;;  %v2543_v33 = vunpack.c.h.bf16 %v3334_v1 }
  0xa3   : > { %v3281_v35 = vsub.f32 %v2494_v2, %v351_v34  ;;  %v3293_v45 = vsub.f32 %v2498_v3, %v353_v36  ;;  %v2873_v3 = vld [vmem:[%s4497_s1 + $0x54] ss:$8 sps:$4 sm:$0xff]  }
  0xa4   : > { %v289_v37 = vpop.xlane.xlu0 %288  ;;  %v293_v39 = vpop.xlane.xlu1 %292  ;;  %835 = vmatprep.subr.bf16.mxu0 %v2873_v3 }
  0xa5   : > { %v352_v40 = vmul.f32 0.0078125, %v289_v37  ;;  %v415_v41 = vmul.f32 %v3281_v35, %v3281_v35  ;;  %v354_v44 = vmul.f32 0.0078125, %v293_v39  ;;  %v417_v48 = vmul.f32 %v3293_v45, %v3293_v45  ;;  %v3367_v37 = vld [vmem:[%s3187_s29 + $0x68] sm:$0xff]  }
  0xa7   : > { %447 = vadd.xlane.f32.xlu0 %v415_v41  ;;  %v3289_v43 = vsub.f32 %v2495_v4, %v352_v40  ;;  %v3304_v51 = vsub.f32 %v2499_v5, %v354_v44  ;;  %v2875_v4 = vld [vmem:[%s4497_s1 + $0x50] ss:$8 sps:$4 sm:$0xff]   ;;  %v2879_v40 = vld [vmem:[%s4497_s1 + $0x34] ss:$8 sps:$4 sm:$0xff]  }
  0xa8   : > { %v295_v46 = vpop.xlane.xlu0 %294  ;;  %v297_v53 = vpop.xlane.xlu1 %296  ;;  %836 = vmatpush1.bf16.msra.mxu0 %v2875_v4  ;;  %v2881_v44 = vld [vmem:[%s4497_s1 + $0x30] ss:$8 sps:$4 sm:$0xff]  }
  0xa9   : > { %v416_v47 = vmul.f32 %v3289_v43, %v3289_v43  ;;  %v355_v50 = vmul.f32 0.0078125, %v295_v46  ;;  %v418_v55 = vmul.f32 %v3304_v51, %v3304_v51  ;;  %v356_v56 = vmul.f32 0.0078125, %v297_v53  ;;  %837 = vmatprep.subr.bf16.mxu0 %v2876_v31 }
  0xaa   : > { %v2551_v31 = vunpack.c.h.bf16 %v3400_v60 }
  0xab   : > { %326 = vadd.xlane.f32.xlu0 %v2534_v42  ;;  %449 = vadd.xlane.f32.xlu1 %v416_v47  ;;  %v3316_v57 = vsub.f32 %v2502_v8, %v355_v50  ;;  %v3331_v0 = vsub.f32 %v2503_v9, %v356_v56  ;;  %v2547_v56 = vunpack.c.h.bf16 %v3367_v37 }
  0xac   : > { %v299_v58 = vpop.xlane.xlu0 %298  ;;  %v301_v2 = vpop.xlane.xlu1 %300  ;;  %838 = vmatpush1.bf16.msra.mxu0 %v2878_v32 }
  0xad   : > { %v419_v62 = vmul.f32 %v3316_v57, %v3316_v57  ;;  %v357_v63 = vmul.f32 0.0078125, %v299_v58  ;;  %v420_v5 = vmul.f32 %v3331_v0, %v3331_v0  ;;  %v358_v8 = vmul.f32 0.0078125, %v301_v2  ;;  %839 = vmatprep.subr.bf16.mxu0 %v2879_v40  ;;  %v2887_v2 = vld [vmem:[%s4497_s1 + $0x10] ss:$8 sps:$4 sm:$0xff]  }
  0xaf   : > { %451 = vadd.xlane.f32.xlu0 %v417_v48  ;;  %328 = vadd.xlane.f32.xlu1 %v2535_v49  ;;  %v3349_v9 = vsub.f32 %v2506_v10, %v357_v63  ;;  %v3364_v36 = vsub.f32 %v2507_v11, %v358_v8  ;;  %v2546_v11 = vunpack.c.l.bf16 %v3367_v37  ;;  %v2882_v48 = vld [vmem:[%s4497_s1 + $0x24] ss:$8 sps:$4 sm:$0xff]  }
  0xb0   : > { %v303_v30 = vpop.xlane.xlu0 %302  ;;  %v305_v39 = vpop.xlane.xlu1 %304  ;;  %840 = vmatpush1.bf16.msra.mxu0 %v2881_v44  ;;  %v2888_v8 = vld [vmem:[%s4497_s1 + $0x4] ss:$8 sps:$4 sm:$0xff]   ;;  %v3124_v44 = vmov 0  }
  0xb1   : > { %v421_v10 = vmul.f32 %v3349_v9, %v3349_v9  ;;  %v359_v34 = vmul.f32 0.0078125, %v303_v30  ;;  %v422_v7 = vmul.f32 %v3364_v36, %v3364_v36  ;;  %v360_v46 = vmul.f32 0.0078125, %v305_v39  ;;  %841 = vmatprep.subr.bf16.mxu0 %v2882_v48  ;;  %v2890_v30 = vld [vmem:[%s4497_s1] ss:$8 sps:$4 sm:$0xff]   ;;  %863 = vmatprep.mubr.bf16.mxu0 %v3124_v44 }
  0xb3   : > { %330 = vadd.xlane.f32.xlu0 %v2538_v54  ;;  %453 = vadd.xlane.f32.xlu1 %v418_v55  ;;  %v3382_v47 = vsub.f32 %v2510_v13, %v359_v34  ;;  %v2884_v55 = vld [vmem:[%s4497_s1 + $0x20] ss:$8 sps:$4 sm:$0xff]   ;;  %v3397_v59 = vsub.f32 %v2511_v14, %v360_v46  ;;  %v2550_v14 = vunpack.c.l.bf16 %v3400_v60  ;;  %v3433_v34 = vld [vmem:[%s3187_s29 + $0x78] sm:$0xff]   ;;  %s197_s29 = sand.u32 1, %s3082_s15  }
  0xb4   : > { %v307_v41 = vpop.xlane.xlu0 %306  ;;  %v309_v50 = vpop.xlane.xlu1 %308  ;;  %842 = vmatpush1.bf16.msra.mxu0 %v2884_v55  ;;  %v2554_v15 = vunpack.c.l.bf16 %v3433_v34  ;;  %v2555_v55 = vunpack.c.h.bf16 %v3433_v34  ;;  %s2373_s25 = sshll.u32 %s197_s29, 7 }
  0xb5   : > { %v423_v13 = vmul.f32 %v3382_v47, %v3382_v47  ;;  %v361_v58 = vmul.f32 0.0078125, %v307_v41  ;;  %v424_v12 = vmul.f32 %v3397_v59, %v3397_v59  ;;  %v362_v3 = vmul.f32 0.0078125, %v309_v50  ;;  %s4259_s15 = scalar_lea.vmem [#allocation2], %s2373_s25  }
  0xb7   : > { %332 = vadd.xlane.f32.xlu1 %v2539_v61  ;;  %455 = vadd.xlane.f32.xlu0 %v419_v62  ;;  %v2885_v62 = vld [vmem:[%s4497_s1 + $0x14] ss:$8 sps:$4 sm:$0xff]   ;;  %v3415_v4 = vsub.f32 %v2514_v16, %v361_v58 }
  0xb8   : > { %v311_v53 = vpop.xlane.xlu0 %310  ;;  %v313_v63 = vpop.xlane.xlu1 %312  ;;  %843 = vmatprep.subr.bf16.mxu0 %v2885_v62 }
  0xb9   : > { %844 = vmatpush1.bf16.msra.mxu0 %v2887_v2  ;;  %v425_v16 = vmul.f32 %v3415_v4, %v3415_v4  ;;  %v363_v32 = vmul.f32 0.0078125, %v311_v53  ;;  %v364_v40 = vmul.f32 0.0078125, %v313_v63 }
  0xba   : > { %845 = vmatprep.subr.bf16.mxu0 %v2888_v8 }
  0xbb   : > { %457 = vadd.xlane.f32.xlu1 %v420_v5  ;;  %334 = vadd.xlane.f32.xlu0 %v2542_v6  ;;  %v3443_v46 = vsub.f32 %v2518_v19, %v363_v32  ;;  %v3447_v50 = vsub.f32 %v2519_v20, %v364_v40 }
  0xbc   : > { %v315_v5 = vpop.xlane.xlu0 %314  ;;  %v317_v39 = vpop.xlane.xlu1 %316 }
  0xbd   : > { %846 = vmatpush1.bf16.msra.mxu0 %v2890_v30  ;;  %v366_v48 = vmul.f32 0.0078125, %v317_v39  ;;  %v428_v18 = vmul.f32 %v3447_v50, %v3447_v50 }
  0xbf   : > { %336 = vadd.xlane.f32.xlu1 %v2543_v33  ;;  %459 = vadd.xlane.f32.xlu0 %v421_v10  ;;  %v3430_v10 = vsub.f32 %v2515_v17, %v362_v3  ;;  %v365_v17 = vmul.f32 0.0078125, %v315_v5  ;;  %v3462_v20 = vsub.f32 %v2523_v23, %v366_v48 }
  0xc0   : > { %v319_v41 = vpop.xlane.xlu0 %318  ;;  %v321_v53 = vpop.xlane.xlu1 %320 }
  0xc1   : > { %v367_v58 = vmul.f32 0.0078125, %v319_v41  ;;  %v3456_v19 = vsub.f32 %v2522_v22, %v365_v17  ;;  %v368_v2 = vmul.f32 0.0078125, %v321_v53  ;;  %v430_v5 = vmul.f32 %v3462_v20, %v3462_v20 }
  0xc3   : > { %461 = vadd.xlane.f32.xlu1 %v422_v7  ;;  %338 = vadd.xlane.f32.xlu0 %v2546_v11  ;;  %v426_v7 = vmul.f32 %v3430_v10, %v3430_v10  ;;  %v429_v63 = vmul.f32 %v3456_v19, %v3456_v19  ;;  %v3470_v22 = vsub.f32 %v2526_v25, %v367_v58 }
  0xc4   : > { %v323_v62 = vpop.xlane.xlu0 %322  ;;  %v325_v3 = vpop.xlane.xlu1 %324  ;;  %v3478_v8 = vsub.f32 %v2527_v26, %v368_v2 }
  0xc5   : > { %v431_v21 = vmul.f32 %v3470_v22, %v3470_v22  ;;  %v370_v23 = vmul.f32 0.0078125, %v325_v3 }
  0xc6   : > { %v432_v25 = vmul.f32 %v3478_v8, %v3478_v8 }
  0xc7   : > { %340 = vadd.xlane.f32.xlu1 %v2547_v56  ;;  %463 = vadd.xlane.f32.xlu0 %v423_v13  ;;  %v427_v13 = vmul.f32 %v3443_v46, %v3443_v46  ;;  %v3490_v32 = vsub.f32 %v2531_v29, %v370_v23 }
  0xc9   : > { %v434_v24 = vmul.f32 %v3490_v32, %v3490_v32 }
  0xcb   : > { %465 = vadd.xlane.f32.xlu1 %v424_v12  ;;  %342 = vadd.xlane.f32.xlu0 %v2550_v14  ;;  %v369_v12 = vmul.f32 0.0078125, %v323_v62 }
  0xcd   : > { %v3482_v30 = vsub.f32 %v2530_v28, %v369_v12 }
  0xcf   : > { %344 = vadd.xlane.f32.xlu1 %v2551_v31  ;;  %467 = vadd.xlane.f32.xlu0 %v425_v16  ;;  %v433_v16 = vmul.f32 %v3482_v30, %v3482_v30 }
  0xd3   : > { %469 = vadd.xlane.f32.xlu1 %v426_v7  ;;  %346 = vadd.xlane.f32.xlu0 %v2554_v15 }
  0xd7   : > { %348 = vadd.xlane.f32.xlu1 %v2555_v55  ;;  %471 = vadd.xlane.f32.xlu0 %v427_v13  ;;  %v639_v13 = vlaneseq }
  0xdb   : > { %473 = vadd.xlane.f32.xlu1 %v428_v18  ;;  %475 = vadd.xlane.f32.xlu0 %v429_v63 }
  0xdf   : > { %477 = vadd.xlane.f32.xlu1 %v430_v5  ;;  %479 = vadd.xlane.f32.xlu0 %v431_v21  ;;  %v3504_v5 = vshrl.u32 %v639_v13, 7 }
  0xe1   : > { %v677_v13 = vsub.s32 3, %v3504_v5 }
  0xe3   : > { %481 = vadd.xlane.f32.xlu1 %v432_v25  ;;  %483 = vadd.xlane.f32.xlu0 %v433_v16 }
  0xe7   : > { %485 = vadd.xlane.f32.xlu1 %v434_v24 }
 0x130   : > { %v448_v26 = vpop.xlane.xlu0 %447 }
 0x131   : > { %v511_v28 = vmul.f32 0.0078125, %v448_v26 }
 0x133   : > { %v543_v39 = vadd.f32 1e-05, %v511_v28 }
 0x134   : > { %v450_v40 = vpop.xlane.xlu1 %449  ;;  %v327_v41 = vpop.xlane.xlu0 %326 }
 0x135   : > { %2907 = vrsqrt.f32 %v543_v39  ;;  %v512_v7 = vmul.f32 0.0078125, %v450_v40  ;;  %v371_v17 = vmul.f32 0.0078125, %v327_v41  ;;  %v3518_v40 = vld [vmem:[%s4499_s3] sm:$0xff] }
 0x137   : > { %v544_v48 = vadd.f32 1e-05, %v512_v7  ;;  %v3496_v27 = vsub.f32 %v2534_v42, %v371_v17 }
 0x138   : > { %v329_v29 = vpop.xlane.xlu1 %328  ;;  %v452_v53 = vpop.xlane.xlu0 %451 }
 0x139   : > { %2909 = vrsqrt.f32 %v544_v48  ;;  %v372_v58 = vmul.f32 0.0078125, %v329_v29  ;;  %v513_v62 = vmul.f32 0.0078125, %v452_v53  ;;  %v435_v18 = vmul.f32 %v3496_v27, %v3496_v27 }
 0x13b   : > { %v545_v63 = vadd.f32 1e-05, %v513_v62  ;;  %487 = vadd.xlane.f32.xlu0 %v435_v18  ;;  %v3502_v2 = vsub.f32 %v2535_v49, %v372_v58  ;;  %v641_v49 = vsub.s32 2, %v3504_v5 }
 0x13c   : > { %v454_v12 = vpop.xlane.xlu1 %453  ;;  %v331_v3 = vpop.xlane.xlu0 %330 }
 0x13d   : > { %2911 = vrsqrt.f32 %v545_v63  ;;  %v514_v42 = vmul.f32 0.0078125, %v454_v12  ;;  %v373_v21 = vmul.f32 0.0078125, %v331_v3  ;;  %v436_v23 = vmul.f32 %v3502_v2, %v3502_v2 }
 0x13e   : > { %v3526_v53 = vrot.slane %v3518_v40, %v641_v49 }
 0x13f   : > { %v546_v25 = vadd.f32 1e-05, %v514_v42  ;;  %489 = vadd.xlane.f32.xlu1 %v436_v23  ;;  %v3510_v16 = vsub.f32 %v2538_v54, %v373_v21  ;;  %v3538_v21 = vrot.slane %v3518_v40, %v677_v13 }
 0x140   : > { %v333_v24 = vpop.xlane.xlu1 %332  ;;  %v456_v38 = vpop.xlane.xlu0 %455 }
 0x141   : > { %2913 = vrsqrt.f32 %v546_v25  ;;  %v374_v26 = vmul.f32 0.0078125, %v333_v24  ;;  %v515_v28 = vmul.f32 0.0078125, %v456_v38  ;;  %v437_v39 = vmul.f32 %v3510_v16, %v3510_v16 }
 0x142   : > { %v2908_v41 = vpop.eup %2907 }
 0x143   : > { %v547_v7 = vadd.f32 1e-05, %v515_v28  ;;  %491 = vadd.xlane.f32.xlu0 %v437_v39  ;;  %v3522_v54 = vsub.f32 %v2539_v61, %v374_v26  ;;  %v607_v29 = vmul.f32 %v2908_v41, %v3281_v35 }
 0x144   : > { %v458_v17 = vpop.xlane.xlu1 %457  ;;  %v335_v48 = vpop.xlane.xlu0 %334 }
 0x145   : > { %2915 = vrsqrt.f32 %v547_v7  ;;  %v516_v58 = vmul.f32 0.0078125, %v458_v17  ;;  %v375_v62 = vmul.f32 0.0078125, %v335_v48  ;;  %v438_v18 = vmul.f32 %v3522_v54, %v3522_v54 }
 0x146   : > { %v2910_v63 = vpop.eup %2909  ;;  %v643_v42 = vmul.f32 %v3526_v53, %v607_v29 }
 0x147   : > { %v548_v12 = vadd.f32 1e-05, %v516_v58  ;;  %v3533_v52 = vsub.f32 %v2542_v6, %v375_v62  ;;  %493 = vadd.xlane.f32.xlu1 %v438_v18  ;;  %v608_v35 = vmul.f32 %v2910_v63, %v3289_v43 }
 0x148   : > { %v337_v61 = vpop.xlane.xlu1 %336  ;;  %v460_v3 = vpop.xlane.xlu0 %459  ;;  %v3548_v39 = vadd.f32 %v3538_v21, %v643_v42 }
 0x149   : > { %2917 = vrsqrt.f32 %v548_v12  ;;  %v376_v23 = vmul.f32 0.0078125, %v337_v61  ;;  %v517_v25 = vmul.f32 0.0078125, %v460_v3  ;;  %v439_v24 = vmul.f32 %v3533_v52, %v3533_v52 }
 0x14a   : > { %v2912_v38 = vpop.eup %2911  ;;  %v644_v6 = vmul.f32 %v3526_v53, %v608_v35 }
 0x14b   : > { %v3545_v49 = vsub.f32 %v2543_v33, %v376_v23  ;;  %v549_v43 = vadd.f32 1e-05, %v517_v25  ;;  %495 = vadd.xlane.f32.xlu0 %v439_v24  ;;  %v609_v7 = vmul.f32 %v2912_v38, %v3293_v45 }
 0x14c   : > { %v462_v26 = vpop.xlane.xlu1 %461  ;;  %v339_v28 = vpop.xlane.xlu0 %338  ;;  %v3551_v41 = vadd.f32 %v3538_v21, %v644_v6 }
 0x14d   : > { %2919 = vrsqrt.f32 %v549_v43  ;;  %v518_v17 = vmul.f32 0.0078125, %v462_v26  ;;  %v377_v48 = vmul.f32 0.0078125, %v339_v28  ;;  %v440_v1 = vmul.f32 %v3545_v49, %v3545_v49 }
 0x14e   : > { %v2914_v33 = vpop.eup %2913  ;;  %v711_v29 = vpack.c.bf16 %v3551_v41, %v3548_v39  ;;  %v645_v63 = vmul.f32 %v3526_v53, %v609_v7 }
 0x14f   : > { %v550_v13 = vadd.f32 1e-05, %v518_v17  ;;  %v3560_v58 = vsub.f32 %v2546_v11, %v377_v48  ;;  %497 = vadd.xlane.f32.xlu1 %v440_v1  ;;  %v610_v62 = vmul.f32 %v2914_v33, %v3304_v51 }
 0x150   : > { %864 = vmatmul.mubr.bf16.vlgmr.msra.gmra.mxu0 %v711_v29  ;;  %v341_v45 = vpop.xlane.xlu1 %340  ;;  %v464_v18 = vpop.xlane.xlu0 %463  ;;  %v3573_v24 = vadd.f32 %v3538_v21, %v645_v63 }
 0x151   : > { %2921 = vrsqrt.f32 %v550_v13  ;;  %v378_v12 = vmul.f32 0.0078125, %v341_v45  ;;  %v519_v35 = vmul.f32 0.0078125, %v464_v18  ;;  %v441_v61 = vmul.f32 %v3560_v58, %v3560_v58  ;;  %873 = vmatprep.mubr.bf16.mxu0 %v3124_v44 }
 0x152   : > { %v2916_v3 = vpop.eup %2915  ;;  %v646_v11 = vmul.f32 %v3526_v53, %v610_v62 }
 0x153   : > { %v3570_v42 = vsub.f32 %v2547_v56, %v378_v12  ;;  %v551_v51 = vadd.f32 1e-05, %v519_v35  ;;  %499 = vadd.xlane.f32.xlu0 %v441_v61  ;;  %v611_v6 = vmul.f32 %v2916_v3, %v3316_v57 }
 0x154   : > { %v466_v23 = vpop.xlane.xlu1 %465  ;;  %v343_v25 = vpop.xlane.xlu0 %342  ;;  %v3576_v38 = vadd.f32 %v3538_v21, %v646_v11 }
 0x155   : > { %2923 = vrsqrt.f32 %v551_v51  ;;  %v520_v43 = vmul.f32 0.0078125, %v466_v23  ;;  %v379_v26 = vmul.f32 0.0078125, %v343_v25  ;;  %v442_v37 = vmul.f32 %v3570_v42, %v3570_v42 }
 0x156   : > { %v2918_v56 = vpop.eup %2917  ;;  %v712_v28 = vpack.c.bf16 %v3576_v38, %v3573_v24  ;;  %v647_v33 = vmul.f32 %v3526_v53, %v611_v6 }
 0x157   : > { %v552_v7 = vadd.f32 1e-05, %v520_v43  ;;  %v3585_v17 = vsub.f32 %v2550_v14, %v379_v26  ;;  %501 = vadd.xlane.f32.xlu1 %v442_v37  ;;  %v612_v48 = vmul.f32 %v2918_v56, %v3331_v0 }
 0x158   : > { %874 = vmatmul.mubr.bf16.gmra.mxu0 %v712_v28  ;;  %v345_v57 = vpop.xlane.xlu1 %344  ;;  %v468_v1 = vpop.xlane.xlu0 %467  ;;  %v3598_v35 = vadd.f32 %v3538_v21, %v647_v33 }
 0x159   : > { %2925 = vrsqrt.f32 %v552_v7  ;;  %v380_v29 = vmul.f32 0.0078125, %v345_v57  ;;  %v521_v13 = vmul.f32 0.0078125, %v468_v1  ;;  %v443_v62 = vmul.f32 %v3585_v17, %v3585_v17  ;;  %883 = vmatprep.mubr.bf16.mxu0 %v3124_v44 }
 0x15a   : > { %v2920_v45 = vpop.eup %2919  ;;  %v648_v14 = vmul.f32 %v3526_v53, %v612_v48 }
 0x15b   : > { %v3595_v18 = vsub.f32 %v2551_v31, %v380_v29  ;;  %v553_v0 = vadd.f32 1e-05, %v521_v13  ;;  %503 = vadd.xlane.f32.xlu0 %v443_v62  ;;  %v613_v3 = vmul.f32 %v2920_v45, %v3349_v9 }
 0x15c   : > { %v470_v63 = vpop.xlane.xlu1 %469  ;;  %v347_v12 = vpop.xlane.xlu0 %346  ;;  %v3601_v61 = vadd.f32 %v3538_v21, %v648_v14 }
 0x15d   : > { %2927 = vrsqrt.f32 %v553_v0  ;;  %v522_v11 = vmul.f32 0.0078125, %v470_v63  ;;  %v381_v51 = vmul.f32 0.0078125, %v347_v12  ;;  %v444_v60 = vmul.f32 %v3595_v18, %v3595_v18 }
 0x15e   : > { %v2922_v31 = vpop.eup %2921  ;;  %v713_v23 = vpack.c.bf16 %v3601_v61, %v3598_v35  ;;  %v649_v37 = vmul.f32 %v3526_v53, %v613_v3 }
 0x15f   : > { %v554_v25 = vadd.f32 1e-05, %v522_v11  ;;  %v3610_v6 = vsub.f32 %v2554_v15, %v381_v51  ;;  %505 = vadd.xlane.f32.xlu1 %v444_v60  ;;  %v614_v43 = vmul.f32 %v2922_v31, %v3364_v36 }
 0x160   : > { %884 = vmatmul.mubr.bf16.gmra.mxu0 %v713_v23  ;;  %v349_v9 = vpop.xlane.xlu1 %348  ;;  %v472_v26 = vpop.xlane.xlu0 %471  ;;  %v3624_v13 = vadd.f32 %v3538_v21, %v649_v37 }
 0x161   : > { %2929 = vrsqrt.f32 %v554_v25  ;;  %v382_v56 = vmul.f32 0.0078125, %v349_v9  ;;  %v523_v28 = vmul.f32 0.0078125, %v472_v26  ;;  %v445_v7 = vmul.f32 %v3610_v6, %v3610_v6  ;;  %893 = vmatprep.mubr.bf16.mxu0 %v3124_v44 }
 0x162   : > { %v2924_v48 = vpop.eup %2923  ;;  %v650_v15 = vmul.f32 %v3526_v53, %v614_v43 }
 0x163   : > { %v3620_v57 = vsub.f32 %v2555_v55, %v382_v56  ;;  %v555_v36 = vadd.f32 1e-05, %v523_v28  ;;  %507 = vadd.xlane.f32.xlu0 %v445_v7  ;;  %v615_v1 = vmul.f32 %v2924_v48, %v3382_v47 }
 0x164   : > { %v474_v33 = vpop.xlane.xlu1 %473  ;;  %v476_v29 = vpop.xlane.xlu0 %475  ;;  %v3627_v62 = vadd.f32 %v3538_v21, %v650_v15 }
 0x165   : > { %2931 = vrsqrt.f32 %v555_v36  ;;  %v524_v45 = vmul.f32 0.0078125, %v474_v33  ;;  %v525_v14 = vmul.f32 0.0078125, %v476_v29  ;;  %v446_v34 = vmul.f32 %v3620_v57, %v3620_v57 }
 0x166   : > { %v2926_v55 = vpop.eup %2925  ;;  %v714_v0 = vpack.c.bf16 %v3627_v62, %v3624_v13  ;;  %v651_v12 = vmul.f32 %v3526_v53, %v615_v1 }
 0x167   : > { %v556_v63 = vadd.f32 1e-05, %v524_v45  ;;  %509 = vadd.xlane.f32.xlu1 %v446_v34  ;;  %v616_v47 = vmul.f32 %v2926_v55, %v3397_v59  ;;  %v557_v3 = vadd.f32 1e-05, %v525_v14 }
 0x168   : > { %894 = vmatmul.mubr.bf16.gmra.mxu0 %v714_v0  ;;  %v478_v11 = vpop.xlane.xlu1 %477  ;;  %v480_v60 = vpop.xlane.xlu0 %479  ;;  %v3638_v43 = vadd.f32 %v3538_v21, %v651_v12 }
 0x169   : > { %2933 = vrsqrt.f32 %v556_v63  ;;  %v526_v51 = vmul.f32 0.0078125, %v478_v11  ;;  %903 = vmatprep.mubr.bf16.mxu0 %v3124_v44  ;;  %v652_v31 = vmul.f32 %v3526_v53, %v616_v47  ;;  %v527_v26 = vmul.f32 0.0078125, %v480_v60 }
 0x16a   : > { %v2928_v23 = vpop.eup %2927  ;;  %2935 = vrsqrt.f32 %v557_v3 }
 0x16b   : > { %v558_v25 = vadd.f32 1e-05, %v526_v51  ;;  %v3641_v9 = vadd.f32 %v3538_v21, %v652_v31  ;;  %v617_v59 = vmul.f32 %v2928_v23, %v3415_v4  ;;  %v559_v1 = vadd.f32 1e-05, %v527_v26  ;;  %v2892_v26 = vld [vmem:[%s4498_s2 + $0x38] sm:$0xff]  }
 0x16c   : > { %v482_v37 = vpop.xlane.xlu1 %481  ;;  %v484_v29 = vpop.xlane.xlu0 %483 }
 0x16d   : > { %2937 = vrsqrt.f32 %v558_v25  ;;  %v528_v56 = vmul.f32 0.0078125, %v482_v37  ;;  %v715_v28 = vpack.c.bf16 %v3641_v9, %v3638_v43  ;;  %v653_v36 = vmul.f32 %v3526_v53, %v617_v59  ;;  %v2893_v37 = vld [vmem:[%s4498_s2 + $0x70] sm:$0xff]  }
 0x16e   : > { %v2930_v7 = vpop.eup %2929  ;;  %v529_v0 = vmul.f32 0.0078125, %v484_v29  ;;  %v2896_v29 = vld [vmem:[%s4498_s2 + $0x28] sm:$0xff]  }
 0x16f   : > { %v560_v48 = vadd.f32 1e-05, %v528_v56  ;;  %v618_v15 = vmul.f32 %v2930_v7, %v3430_v10  ;;  %v3651_v34 = vadd.f32 %v3538_v21, %v653_v36  ;;  %v2894_v7 = vld [vmem:[%s4498_s2 + $0x30] sm:$0xff]  }
 0x170   : > { %904 = vmatmul.mubr.bf16.gmra.mxu0 %v715_v28  ;;  %v486_v33 = vpop.xlane.xlu1 %485  ;;  %v561_v51 = vadd.f32 1e-05, %v529_v0  ;;  %v2898_v0 = vld [vmem:[%s4498_s2 + $0x20] sm:$0xff]  }
 0x171   : > { %913 = vmatprep.mubr.bf16.mxu0 %v3124_v44  ;;  %v654_v4 = vmul.f32 %v3526_v53, %v618_v15  ;;  %2939 = vrsqrt.f32 %v560_v48  ;;  %v530_v14 = vmul.f32 0.0078125, %v486_v33  ;;  %v2895_v33 = vld [vmem:[%s4498_s2 + $0x68] sm:$0xff]  }
 0x172   : > { %v2932_v45 = vpop.eup %2931  ;;  %2941 = vrsqrt.f32 %v559_v1 }
 0x173   : > { %v3654_v55 = vadd.f32 %v3538_v21, %v654_v4  ;;  %v619_v10 = vmul.f32 %v2932_v45, %v3443_v46  ;;  %v562_v12 = vadd.f32 1e-05, %v530_v14  ;;  %v2897_v4 = vld [vmem:[%s4498_s2 + $0x60] sm:$0xff]  }
 0x175   : > { %v716_v63 = vpack.c.bf16 %v3654_v55, %v3651_v34  ;;  %v655_v11 = vmul.f32 %v3526_v53, %v619_v10  ;;  %2943 = vrsqrt.f32 %v562_v12 }
 0x176   : > { %v2934_v47 = vpop.eup %2933  ;;  %2945 = vrsqrt.f32 %v561_v51  ;;  %v2900_v51 = vld [vmem:[%s4498_s2 + $0x18] sm:$0xff]  }
 0x177   : > { %v620_v3 = vmul.f32 %v2934_v47, %v3447_v50  ;;  %v2936_v60 = vpop.eup %2935  ;;  %v3664_v46 = vadd.f32 %v3538_v21, %v655_v11  ;;  %v2891_v50 = vld [vmem:[%s4498_s2 + $0x78] sm:$0xff]  }
 0x178   : > { %914 = vmatmul.mubr.bf16.gmra.mxu0 %v716_v63  ;;  %v621_v56 = vmul.f32 %v2936_v60, %v3456_v19  ;;  %2666 = vmatprep.subr.bf16.mxu1 %v2891_v50  ;;  %v2899_v11 = vld [vmem:[%s4498_s2 + $0x58] sm:$0xff]   ;;  %v2901_v50 = vld [vmem:[%s4498_s2 + $0x50] sm:$0xff]  }
 0x179   : > { %923 = vmatprep.mubr.bf16.mxu0 %v3124_v44  ;;  %v656_v31 = vmul.f32 %v3526_v53, %v620_v3  ;;  %2667 = vmatpush3.bf16.msra.mxu1 %v2892_v26 }
 0x17a   : > { %v2938_v23 = vpop.eup %2937  ;;  %2668 = vmatprep.subr.bf16.mxu1 %v2893_v37  ;;  %v657_v15 = vmul.f32 %v3526_v53, %v621_v56  ;;  %v2903_v56 = vld [vmem:[%s4498_s2 + $0x48] sm:$0xff]  }
 0x17b   : > { %v3667_v25 = vadd.f32 %v3538_v21, %v656_v31  ;;  %v622_v59 = vmul.f32 %v2938_v23, %v3462_v20 }
 0x17c   : > { %v3702_v45 = vadd.f32 %v3538_v21, %v657_v15 }
 0x17d   : > { %v717_v28 = vpack.c.bf16 %v3667_v25, %v3664_v46  ;;  %v658_v20 = vmul.f32 %v3526_v53, %v622_v59  ;;  %2669 = vmatpush3.bf16.msra.mxu1 %v2894_v7  ;;  %v2905_v7 = vld [vmem:[%s4498_s2 + $0x40] sm:$0xff]  }
 0x17e   : > { %v2940_v48 = vpop.eup %2939  ;;  %2670 = vmatprep.subr.bf16.mxu1 %v2895_v33 }
 0x17f   : > { %v2942_v36 = vpop.eup %2941  ;;  %v3689_v19 = vadd.f32 %v3538_v21, %v658_v20  ;;  %v624_v1 = vmul.f32 %v2940_v48, %v3478_v8  ;;  %v2906_v48 = vld [vmem:[%s4498_s2] sm:$0xff]  }
 0x180   : > { %924 = vmatmul.mubr.bf16.gmra.mxu0 %v717_v28  ;;  %v623_v14 = vmul.f32 %v2942_v36, %v3470_v22  ;;  %v2904_v28 = vld [vmem:[%s4498_s2 + $0x8] sm:$0xff]  }
 0x181   : > { %933 = vmatprep.mubr.bf16.mxu0 %v3124_v44  ;;  %v718_v8 = vpack.c.bf16 %v3689_v19, %v3702_v45  ;;  %v660_v10 = vmul.f32 %v3526_v53, %v624_v1  ;;  %2671 = vmatpush3.bf16.msra.mxu1 %v2896_v29 }
 0x182   : > { %v2944_v63 = vpop.eup %2943  ;;  %2672 = vmatprep.subr.bf16.mxu1 %v2897_v4  ;;  %v659_v47 = vmul.f32 %v3526_v53, %v623_v14 }
 0x183   : > { %v2946_v12 = vpop.eup %2945  ;;  %v3714_v22 = vadd.f32 %v3538_v21, %v660_v10  ;;  %v626_v3 = vmul.f32 %v2944_v63, %v3490_v32 }
 0x184   : > { %v3724_v60 = vadd.f32 %v3538_v21, %v659_v47  ;;  %v625_v31 = vmul.f32 %v2946_v12, %v3482_v30  ;;  %v2902_v30 = vld [vmem:[%s4498_s2 + $0x10] sm:$0xff]  }
 0x185   : > { %2673 = vmatpush3.bf16.msra.mxu1 %v2898_v0  ;;  %v662_v32 = vmul.f32 %v3526_v53, %v626_v3 }
 0x186   : > { %2674 = vmatprep.subr.bf16.mxu1 %v2899_v11  ;;  %v719_v23 = vpack.c.bf16 %v3714_v22, %v3724_v60  ;;  %v661_v59 = vmul.f32 %v3526_v53, %v625_v31 }
 0x187   : > { %v3739_v26 = vadd.f32 %v3538_v21, %v662_v32 }
 0x188   : > { %934 = vmatmul.mubr.bf16.gmra.mxu0 %v718_v8  ;;  %v3742_v37 = vadd.f32 %v3538_v21, %v661_v59 }
 0x189   : > { %943 = vmatprep.mubr.bf16.mxu0 %v3124_v44  ;;  %2675 = vmatpush3.bf16.msra.mxu1 %v2900_v51 }
 0x18a   : > { %2676 = vmatprep.subr.bf16.mxu1 %v2901_v50  ;;  %v720_v20 = vpack.c.bf16 %v3739_v26, %v3742_v37 }
 0x18d   : > { %2677 = vmatpush3.bf16.msra.mxu1 %v2902_v30 }
 0x18e   : > { %2678 = vmatprep.subr.bf16.mxu1 %v2903_v56 }
 0x190   : > { %944 = vmatmul.mubr.bf16.gmra.mxu0 %v719_v23 }
 0x191   : > { %953 = vmatprep.mubr.bf16.mxu0 %v3124_v44  ;;  %2679 = vmatpush3.bf16.msra.mxu1 %v2904_v28 }
 0x192   : > { %2680 = vmatprep.subr.bf16.mxu1 %v2905_v7 }
 0x195   : > { %2681 = vmatpush3.bf16.msra.mxu1 %v2906_v48 }
 0x198   : > { %954 = vmatmul.mubr.bf16.gmra.mxu0 %v720_v20 }
 0x199   : > { %963 = vmatprep.mubr.bf16.mxu0 %v3124_v44 }
 0x1c4   : > { %v488_v15 = vpop.xlane.xlu0 %487 }
 0x1c5   : > { %v531_v36 = vmul.f32 0.0078125, %v488_v15 }
 0x1c7   : > { %v563_v1 = vadd.f32 1e-05, %v531_v36 }
 0x1c8   : > { %v490_v33 = vpop.xlane.xlu1 %489 }
 0x1c9   : > { %2947 = vrsqrt.f32 %v563_v1  ;;  %v532_v29 = vmul.f32 0.0078125, %v490_v33 }
 0x1cb   : > { %v564_v4 = vadd.f32 1e-05, %v532_v29 }
 0x1cc   : > { %v492_v14 = vpop.xlane.xlu0 %491 }
 0x1cd   : > { %2949 = vrsqrt.f32 %v564_v4  ;;  %v533_v8 = vmul.f32 0.0078125, %v492_v14 }
 0x1cf   : > { %v565_v10 = vadd.f32 1e-05, %v533_v8 }
 0x1d0   : > { %v494_v0 = vpop.xlane.xlu1 %493 }
 0x1d1   : > { %2951 = vrsqrt.f32 %v565_v10  ;;  %v534_v63 = vmul.f32 0.0078125, %v494_v0 }
 0x1d3   : > { %v566_v47 = vadd.f32 1e-05, %v534_v63 }
 0x1d4   : > { %v496_v12 = vpop.xlane.xlu0 %495 }
 0x1d5   : > { %2953 = vrsqrt.f32 %v566_v47  ;;  %v535_v3 = vmul.f32 0.0078125, %v496_v12 }
 0x1d6   : > { %v2948_v11 = vpop.eup %2947 }
 0x1d7   : > { %v567_v51 = vadd.f32 1e-05, %v535_v3  ;;  %v627_v31 = vmul.f32 %v2948_v11, %v3496_v27 }
 0x1d8   : > { %v498_v23 = vpop.xlane.xlu1 %497 }
 0x1d9   : > { %2955 = vrsqrt.f32 %v567_v51  ;;  %v536_v32 = vmul.f32 0.0078125, %v498_v23  ;;  %v663_v56 = vmul.f32 %v3526_v53, %v627_v31 }
 0x1da   : > { %v2950_v59 = vpop.eup %2949 }
 0x1db   : > { %v568_v50 = vadd.f32 1e-05, %v536_v32  ;;  %v628_v30 = vmul.f32 %v2950_v59, %v3502_v2  ;;  %v3764_v36 = vadd.f32 %v3538_v21, %v663_v56 }
 0x1dc   : > { %v500_v28 = vpop.xlane.xlu0 %499 }
 0x1dd   : > { %2957 = vrsqrt.f32 %v568_v50  ;;  %v537_v20 = vmul.f32 0.0078125, %v500_v28  ;;  %v664_v7 = vmul.f32 %v3526_v53, %v628_v30 }
 0x1de   : > { %v2952_v48 = vpop.eup %2951 }
 0x1df   : > { %v569_v15 = vadd.f32 1e-05, %v537_v20  ;;  %v3767_v27 = vadd.f32 %v3538_v21, %v664_v7  ;;  %v629_v1 = vmul.f32 %v2952_v48, %v3510_v16 }
 0x1e0   : > { %v502_v33 = vpop.xlane.xlu1 %501 }
 0x1e1   : > { %2959 = vrsqrt.f32 %v569_v15  ;;  %v538_v2 = vmul.f32 0.0078125, %v502_v33  ;;  %v721_v29 = vpack.c.bf16 %v3767_v27, %v3764_v36  ;;  %v665_v10 = vmul.f32 %v3526_v53, %v629_v1 }
 0x1e2   : > { %v2954_v4 = vpop.eup %2953 }
 0x1e3   : > { %v570_v14 = vadd.f32 1e-05, %v538_v2  ;;  %964 = vmatmul.mubr.bf16.gmra.mxu0 %v721_v29  ;;  %v630_v8 = vmul.f32 %v2954_v4, %v3522_v54  ;;  %v3777_v3 = vadd.f32 %v3538_v21, %v665_v10 }
 0x1e4   : > { %v504_v0 = vpop.xlane.xlu0 %503  ;;  %973 = vmatprep.mubr.bf16.mxu0 %v3124_v44 }
 0x1e5   : > { %2961 = vrsqrt.f32 %v570_v14  ;;  %v539_v63 = vmul.f32 0.0078125, %v504_v0  ;;  %v666_v16 = vmul.f32 %v3526_v53, %v630_v8 }
 0x1e6   : > { %v2956_v47 = vpop.eup %2955 }
 0x1e7   : > { %v571_v12 = vadd.f32 1e-05, %v539_v63  ;;  %v3780_v11 = vadd.f32 %v3538_v21, %v666_v16  ;;  %v631_v51 = vmul.f32 %v2956_v47, %v3533_v52 }
 0x1e8   : > { %v506_v54 = vpop.xlane.xlu1 %505 }
 0x1e9   : > { %2963 = vrsqrt.f32 %v571_v12  ;;  %v540_v31 = vmul.f32 0.0078125, %v506_v54  ;;  %v722_v23 = vpack.c.bf16 %v3780_v11, %v3777_v3  ;;  %v667_v30 = vmul.f32 %v3526_v53, %v631_v51 }
 0x1ea   : > { %v2958_v32 = vpop.eup %2957 }
 0x1eb   : > { %v572_v59 = vadd.f32 1e-05, %v540_v31  ;;  %974 = vmatmul.mubr.bf16.gmra.mxu0 %v722_v23  ;;  %v632_v50 = vmul.f32 %v2958_v32, %v3545_v49  ;;  %v3790_v48 = vadd.f32 %v3538_v21, %v667_v30 }
 0x1ec   : > { %v508_v56 = vpop.xlane.xlu0 %507  ;;  %983 = vmatprep.mubr.bf16.mxu0 %v3124_v44 }
 0x1ed   : > { %2965 = vrsqrt.f32 %v572_v59  ;;  %v541_v28 = vmul.f32 0.0078125, %v508_v56  ;;  %v668_v52 = vmul.f32 %v3526_v53, %v632_v50 }
 0x1ee   : > { %v2960_v20 = vpop.eup %2959 }
 0x1ef   : > { %v573_v7 = vadd.f32 1e-05, %v541_v28  ;;  %v3793_v15 = vadd.f32 %v3538_v21, %v668_v52  ;;  %v633_v1 = vmul.f32 %v2960_v20, %v3560_v58  ;;  %v745_v20 = vsub.s32 0, %v3504_v5 }
 0x1f0   : > { %v510_v49 = vpop.xlane.xlu1 %509 }
 0x1f1   : > { %2967 = vrsqrt.f32 %v573_v7  ;;  %v542_v33 = vmul.f32 0.0078125, %v510_v49  ;;  %v723_v2 = vpack.c.bf16 %v3793_v15, %v3790_v48  ;;  %v669_v8 = vmul.f32 %v3526_v53, %v633_v1 }
 0x1f2   : > { %v2962_v29 = vpop.eup %2961 }
 0x1f3   : > { %v574_v4 = vadd.f32 1e-05, %v542_v33  ;;  %984 = vmatmul.mubr.bf16.gmra.mxu0 %v723_v2  ;;  %v634_v14 = vmul.f32 %v2962_v29, %v3570_v42  ;;  %v3803_v58 = vadd.f32 %v3538_v21, %v669_v8 }
 0x1f4   : > { %993 = vmatprep.mubr.bf16.mxu0 %v3124_v44 }
 0x1f5   : > { %2969 = vrsqrt.f32 %v574_v4  ;;  %v670_v10 = vmul.f32 %v3526_v53, %v634_v14 }
 0x1f6   : > { %v2964_v0 = vpop.eup %2963 }
 0x1f7   : > { %v3806_v63 = vadd.f32 %v3538_v21, %v670_v10  ;;  %v635_v16 = vmul.f32 %v2964_v0, %v3585_v17 }
 0x1f9   : > { %v724_v47 = vpack.c.bf16 %v3806_v63, %v3803_v58  ;;  %v671_v51 = vmul.f32 %v3526_v53, %v635_v16 }
 0x1fa   : > { %v2966_v42 = vpop.eup %2965 }
 0x1fb   : > { %994 = vmatmul.mubr.bf16.gmra.mxu0 %v724_v47  ;;  %v636_v12 = vmul.f32 %v2966_v42, %v3595_v18  ;;  %v3816_v23 = vadd.f32 %v3538_v21, %v671_v51 }
 0x1fc   : > { %1003 = vmatprep.mubr.bf16.mxu0 %v3124_v44 }
 0x1fd   : > { %v672_v54 = vmul.f32 %v3526_v53, %v636_v12 }
 0x1fe   : > { %v2968_v31 = vpop.eup %2967 }
 0x1ff   : > { %v3819_v32 = vadd.f32 %v3538_v21, %v672_v54  ;;  %v637_v17 = vmul.f32 %v2968_v31, %v3610_v6 }
 0x201   : > { %v725_v59 = vpack.c.bf16 %v3819_v32, %v3816_v23  ;;  %v673_v30 = vmul.f32 %v3526_v53, %v637_v17 }
 0x202   : > { %v2970_v50 = vpop.eup %2969 }
 0x203   : > { %1004 = vmatmul.mubr.bf16.gmra.mxu0 %v725_v59  ;;  %v638_v18 = vmul.f32 %v2970_v50, %v3620_v57  ;;  %v3829_v28 = vadd.f32 %v3538_v21, %v673_v30  ;;  %v221_v57 = vld [vmem:[%s4499_s3 + $0x8] sm:$0xff] }
 0x204   : > { %1013 = vmatprep.mubr.bf16.mxu0 %v3124_v44  ;;  %v3840_v44 = vrot.slane %v221_v57, %v745_v20 }
 0x205   : > { %v674_v56 = vmul.f32 %v3526_v53, %v638_v18  ;;  %v3843_v53 = vrot.slane %v3518_v40, %v745_v20 }
 0x207   : > { %v3832_v52 = vadd.f32 %v3538_v21, %v674_v56 }
 0x209   : > { %v726_v6 = vpack.c.bf16 %v3832_v52, %v3829_v28 }
 0x20b   : > { %1014 = vmatmul.mubr.bf16.gmra.mxu0 %v726_v6 }
 0x210   : > { %v865_v7 = vpop.f32.mrf.mxu0 }
 0x211   : > { %v866_v2 = vadd.f32 %v865_v7, %v3843_v53 }
 0x212   : > { %v867_v1 = vpop.f32.mrf.mxu0 }
 0x213   : > { %v868_v21 = vadd.f32 %v867_v1, %v3840_v44  ;;  %v1024_v16 = vmax.f32 %v866_v2, 0.0 }
 0x214   : > { %v869_v49 = vpop.f32.mrf.mxu0 }
 0x215   : > { %v870_v33 = vadd.f32 %v869_v49, %v3843_v53  ;;  %v1025_v10 = vmax.f32 %v868_v21, 0.0 }
 0x216   : > { %v871_v29 = vpop.f32.mrf.mxu0 }
 0x217   : > { %v872_v4 = vadd.f32 %v871_v29, %v3840_v44  ;;  %v1026_v14 = vmax.f32 %v870_v33, 0.0 }
 0x218   : > { %v875_v8 = vpop.f32.mrf.mxu0 }
 0x219   : > { %v1027_v0 = vmax.f32 %v872_v4, 0.0  ;;  %v1088_v40 = vpack.c.bf16 %v1026_v14, %v1024_v16  ;;  %v876_v31 = vadd.f32 %v875_v8, %v3843_v53 }
 0x21a   : > { %v877_v47 = vpop.f32.mrf.mxu0 }
 0x21b   : > { %v1089_v42 = vpack.c.bf16 %v1027_v0, %v1025_v10  ;;  %v878_v51 = vadd.f32 %v877_v47, %v3840_v44  ;;  %v1028_v6 = vmax.f32 %v876_v31, 0.0 }
 0x21c   : > { %v879_v12 = vpop.f32.mrf.mxu0 }
 0x21d   : > { %v880_v54 = vadd.f32 %v879_v12, %v3843_v53  ;;  %1284 = vmatprep.mubr.bf16.mxu1 %v1089_v42  ;;  %v1029_v30 = vmax.f32 %v878_v51, 0.0 }
 0x21e   : > { %v881_v17 = vpop.f32.mrf.mxu0  ;;  %1285 = vmatmul.mubr.bf16.vlgmr.msra.gmra.mxu1 %v1088_v40 }
 0x21f   : > { %v882_v59 = vadd.f32 %v881_v17, %v3840_v44  ;;  %v1030_v50 = vmax.f32 %v880_v54, 0.0 }
 0x220   : > { %v885_v18 = vpop.f32.mrf.mxu0 }
 0x221   : > { %v1031_v56 = vmax.f32 %v882_v59, 0.0  ;;  %v1090_v7 = vpack.c.bf16 %v1030_v50, %v1028_v6  ;;  %v886_v33 = vadd.f32 %v885_v18, %v3843_v53 }
 0x222   : > { %v887_v20 = vpop.f32.mrf.mxu0 }
 0x223   : > { %v1091_v57 = vpack.c.bf16 %v1031_v56, %v1029_v30  ;;  %v888_v49 = vadd.f32 %v887_v20, %v3840_v44  ;;  %v1032_v0 = vmax.f32 %v886_v33, 0.0 }
 0x224   : > { %v889_v1 = vpop.f32.mrf.mxu0 }
 0x225   : > { %v890_v21 = vadd.f32 %v889_v1, %v3843_v53  ;;  %1292 = vmatprep.mubr.bf16.mxu1 %v1091_v57  ;;  %v1033_v8 = vmax.f32 %v888_v49, 0.0 }
 0x226   : > { %v891_v2 = vpop.f32.mrf.mxu0  ;;  %1293 = vmatmul.mubr.bf16.gmra.mxu1 %v1090_v7 }
 0x227   : > { %v892_v29 = vadd.f32 %v891_v2, %v3840_v44  ;;  %v1034_v4 = vmax.f32 %v890_v21, 0.0 }
 0x228   : > { %v895_v14 = vpop.f32.mrf.mxu0 }
 0x229   : > { %v1035_v10 = vmax.f32 %v892_v29, 0.0  ;;  %v1092_v42 = vpack.c.bf16 %v1034_v4, %v1032_v0  ;;  %v896_v54 = vadd.f32 %v895_v14, %v3843_v53 }
 0x22a   : > { %v897_v16 = vpop.f32.mrf.mxu0 }
 0x22b   : > { %v1093_v47 = vpack.c.bf16 %v1035_v10, %v1033_v8  ;;  %v898_v12 = vadd.f32 %v897_v16, %v3840_v44  ;;  %v1036_v56 = vmax.f32 %v896_v54, 0.0 }
 0x22c   : > { %v899_v40 = vpop.f32.mrf.mxu0 }
 0x22d   : > { %v900_v51 = vadd.f32 %v899_v40, %v3843_v53  ;;  %1300 = vmatprep.mubr.bf16.mxu1 %v1093_v47  ;;  %v1037_v18 = vmax.f32 %v898_v12, 0.0 }
 0x22e   : > { %v901_v31 = vpop.f32.mrf.mxu0  ;;  %1301 = vmatmul.mubr.bf16.gmra.mxu1 %v1092_v42 }
 0x22f   : > { %v902_v17 = vadd.f32 %v901_v31, %v3840_v44  ;;  %v1038_v59 = vmax.f32 %v900_v51, 0.0 }
 0x230   : > { %v905_v50 = vpop.f32.mrf.mxu0 }
 0x231   : > { %v1039_v30 = vmax.f32 %v902_v17, 0.0  ;;  %v1094_v57 = vpack.c.bf16 %v1038_v59, %v1036_v56  ;;  %v906_v21 = vadd.f32 %v905_v50, %v3843_v53 }
 0x232   : > { %v907_v6 = vpop.f32.mrf.mxu0 }
 0x233   : > { %v1095_v20 = vpack.c.bf16 %v1039_v30, %v1037_v18  ;;  %v908_v1 = vadd.f32 %v907_v6, %v3840_v44  ;;  %v1040_v10 = vmax.f32 %v906_v21, 0.0 }
 0x234   : > { %v909_v7 = vpop.f32.mrf.mxu0 }
 0x235   : > { %v910_v49 = vadd.f32 %v909_v7, %v3843_v53  ;;  %1308 = vmatprep.mubr.bf16.mxu1 %v1095_v20  ;;  %v1041_v14 = vmax.f32 %v908_v1, 0.0 }
 0x236   : > { %v911_v33 = vpop.f32.mrf.mxu0  ;;  %1309 = vmatmul.mubr.bf16.gmra.mxu1 %v1094_v57 }
 0x237   : > { %v912_v2 = vadd.f32 %v911_v33, %v3840_v44  ;;  %v1042_v29 = vmax.f32 %v910_v49, 0.0 }
 0x238   : > { %v915_v4 = vpop.f32.mrf.mxu0 }
 0x239   : > { %v1043_v8 = vmax.f32 %v912_v2, 0.0  ;;  %v1096_v47 = vpack.c.bf16 %v1042_v29, %v1040_v10  ;;  %v916_v51 = vadd.f32 %v915_v4, %v3843_v53 }
 0x23a   : > { %v917_v0 = vpop.f32.mrf.mxu0 }
 0x23b   : > { %v1097_v16 = vpack.c.bf16 %v1043_v8, %v1041_v14  ;;  %v918_v40 = vadd.f32 %v917_v0, %v3840_v44  ;;  %v1044_v30 = vmax.f32 %v916_v51, 0.0 }
 0x23c   : > { %v919_v42 = vpop.f32.mrf.mxu0 }
 0x23d   : > { %v920_v12 = vadd.f32 %v919_v42, %v3843_v53  ;;  %1316 = vmatprep.mubr.bf16.mxu1 %v1097_v16  ;;  %v1045_v50 = vmax.f32 %v918_v40, 0.0 }
 0x23e   : > { %v921_v54 = vpop.f32.mrf.mxu0  ;;  %1317 = vmatmul.mubr.bf16.gmra.mxu1 %v1096_v47 }
 0x23f   : > { %v922_v31 = vadd.f32 %v921_v54, %v3840_v44  ;;  %v1046_v17 = vmax.f32 %v920_v12, 0.0 }
 0x240   : > { %v925_v59 = vpop.f32.mrf.mxu0 }
 0x241   : > { %v1047_v18 = vmax.f32 %v922_v31, 0.0  ;;  %v1098_v20 = vpack.c.bf16 %v1046_v17, %v1044_v30  ;;  %v926_v49 = vadd.f32 %v925_v59, %v3843_v53 }
 0x242   : > { %v927_v56 = vpop.f32.mrf.mxu0 }
 0x243   : > { %v1099_v6 = vpack.c.bf16 %v1047_v18, %v1045_v50  ;;  %v928_v7 = vadd.f32 %v927_v56, %v3840_v44  ;;  %v1048_v8 = vmax.f32 %v926_v49, 0.0 }
 0x244   : > { %v929_v57 = vpop.f32.mrf.mxu0 }
 0x245   : > { %v930_v1 = vadd.f32 %v929_v57, %v3843_v53  ;;  %1324 = vmatprep.mubr.bf16.mxu1 %v1099_v6  ;;  %v1049_v4 = vmax.f32 %v928_v7, 0.0 }
 0x246   : > { %v931_v21 = vpop.f32.mrf.mxu0  ;;  %1325 = vmatmul.mubr.bf16.gmra.mxu1 %v1098_v20 }
 0x247   : > { %v932_v33 = vadd.f32 %v931_v21, %v3840_v44  ;;  %v1050_v2 = vmax.f32 %v930_v1, 0.0 }
 0x248   : > { %v935_v29 = vpop.f32.mrf.mxu0 }
 0x249   : > { %v1051_v14 = vmax.f32 %v932_v33, 0.0  ;;  %v1100_v16 = vpack.c.bf16 %v1050_v2, %v1048_v8  ;;  %v936_v12 = vadd.f32 %v935_v29, %v3843_v53 }
 0x24a   : > { %v937_v10 = vpop.f32.mrf.mxu0 }
 0x24b   : > { %v1101_v0 = vpack.c.bf16 %v1051_v14, %v1049_v4  ;;  %v938_v42 = vadd.f32 %v937_v10, %v3840_v44  ;;  %v1052_v18 = vmax.f32 %v936_v12, 0.0 }
 0x24c   : > { %v939_v47 = vpop.f32.mrf.mxu0 }
 0x24d   : > { %v940_v40 = vadd.f32 %v939_v47, %v3843_v53  ;;  %1332 = vmatprep.mubr.bf16.mxu1 %v1101_v0  ;;  %v1053_v59 = vmax.f32 %v938_v42, 0.0 }
 0x24e   : > { %v941_v51 = vpop.f32.mrf.mxu0  ;;  %1333 = vmatmul.mubr.bf16.gmra.mxu1 %v1100_v16 }
 0x24f   : > { %v942_v54 = vadd.f32 %v941_v51, %v3840_v44  ;;  %v1054_v31 = vmax.f32 %v940_v40, 0.0 }
 0x250   : > { %v945_v17 = vpop.f32.mrf.mxu0 }
 0x251   : > { %v1055_v50 = vmax.f32 %v942_v54, 0.0  ;;  %v1102_v6 = vpack.c.bf16 %v1054_v31, %v1052_v18  ;;  %v946_v1 = vadd.f32 %v945_v17, %v3843_v53 }
 0x252   : > { %v947_v30 = vpop.f32.mrf.mxu0 }
 0x253   : > { %v1103_v56 = vpack.c.bf16 %v1055_v50, %v1053_v59  ;;  %v948_v57 = vadd.f32 %v947_v30, %v3840_v44  ;;  %v1056_v14 = vmax.f32 %v946_v1, 0.0 }
 0x254   : > { %v949_v20 = vpop.f32.mrf.mxu0 }
 0x255   : > { %v950_v7 = vadd.f32 %v949_v20, %v3843_v53  ;;  %1340 = vmatprep.mubr.bf16.mxu1 %v1103_v56  ;;  %v1057_v29 = vmax.f32 %v948_v57, 0.0 }
 0x256   : > { %v951_v49 = vpop.f32.mrf.mxu0  ;;  %1341 = vmatmul.mubr.bf16.gmra.mxu1 %v1102_v6 }
 0x257   : > { %v952_v21 = vadd.f32 %v951_v49, %v3840_v44  ;;  %v1058_v33 = vmax.f32 %v950_v7, 0.0 }
 0x258   : > { %v955_v2 = vpop.f32.mrf.mxu0 }
 0x259   : > { %v1059_v4 = vmax.f32 %v952_v21, 0.0  ;;  %v1104_v0 = vpack.c.bf16 %v1058_v33, %v1056_v14  ;;  %v956_v40 = vadd.f32 %v955_v2, %v3843_v53 }
 0x25a   : > { %v957_v8 = vpop.f32.mrf.mxu0 }
 0x25b   : > { %v1105_v10 = vpack.c.bf16 %v1059_v4, %v1057_v29  ;;  %v958_v47 = vadd.f32 %v957_v8, %v3840_v44  ;;  %v1060_v59 = vmax.f32 %v956_v40, 0.0 }
 0x25c   : > { %v959_v16 = vpop.f32.mrf.mxu0 }
 0x25d   : > { %v960_v42 = vadd.f32 %v959_v16, %v3843_v53  ;;  %1348 = vmatprep.mubr.bf16.mxu1 %v1105_v10  ;;  %v1061_v31 = vmax.f32 %v958_v47, 0.0 }
 0x25e   : > { %v961_v12 = vpop.f32.mrf.mxu0  ;;  %1349 = vmatmul.mubr.bf16.gmra.mxu1 %v1104_v0 }
 0x25f   : > { %v962_v51 = vadd.f32 %v961_v12, %v3840_v44  ;;  %v1062_v54 = vmax.f32 %v960_v42, 0.0 }
 0x261   : > { %v1063_v17 = vmax.f32 %v962_v51, 0.0  ;;  %v1106_v18 = vpack.c.bf16 %v1062_v54, %v1060_v59 }
 0x263   : > { %v1107_v50 = vpack.c.bf16 %v1063_v17, %v1061_v31 }
 0x265   : > { %1356 = vmatprep.mubr.bf16.mxu1 %v1107_v50 }
 0x266   : > { %1357 = vmatmul.mubr.bf16.gmra.mxu1 %v1106_v18 }
 0x2a3   : > { %v965_v30 = vpop.f32.mrf.mxu0 }
 0x2a4   : > { %v966_v7 = vadd.f32 %v965_v30, %v3843_v53 }
 0x2a5   : > { %v967_v56 = vpop.f32.mrf.mxu0 }
 0x2a6   : > { %v968_v20 = vadd.f32 %v967_v56, %v3840_v44  ;;  %v1064_v4 = vmax.f32 %v966_v7, 0.0 }
 0x2a7   : > { %v969_v6 = vpop.f32.mrf.mxu0 }
 0x2a8   : > { %v970_v57 = vadd.f32 %v969_v6, %v3843_v53  ;;  %v1065_v2 = vmax.f32 %v968_v20, 0.0 }
 0x2a9   : > { %v971_v1 = vpop.f32.mrf.mxu0 }
 0x2aa   : > { %v972_v49 = vadd.f32 %v971_v1, %v3840_v44  ;;  %v1066_v21 = vmax.f32 %v970_v57, 0.0 }
 0x2ab   : > { %v975_v33 = vpop.f32.mrf.mxu0 }
 0x2ac   : > { %v1067_v29 = vmax.f32 %v972_v49, 0.0  ;;  %v1108_v10 = vpack.c.bf16 %v1066_v21, %v1064_v4  ;;  %v976_v42 = vadd.f32 %v975_v33, %v3843_v53 }
 0x2ad   : > { %v977_v14 = vpop.f32.mrf.mxu0 }
 0x2ae   : > { %v1109_v8 = vpack.c.bf16 %v1067_v29, %v1065_v2  ;;  %v978_v16 = vadd.f32 %v977_v14, %v3840_v44  ;;  %v1068_v59 = vmax.f32 %v976_v42, 0.0 }
 0x2af   : > { %v979_v0 = vpop.f32.mrf.mxu0 }
 0x2b0   : > { %v980_v47 = vadd.f32 %v979_v0, %v3843_v53  ;;  %1364 = vmatprep.mubr.bf16.mxu1 %v1109_v8  ;;  %v1069_v31 = vmax.f32 %v978_v16, 0.0 }
 0x2b1   : > { %v981_v40 = vpop.f32.mrf.mxu0  ;;  %1365 = vmatmul.mubr.bf16.gmra.mxu1 %v1108_v10 }
 0x2b2   : > { %v982_v12 = vadd.f32 %v981_v40, %v3840_v44  ;;  %v1070_v51 = vmax.f32 %v980_v47, 0.0 }
 0x2b3   : > { %v985_v54 = vpop.f32.mrf.mxu0 }
 0x2b4   : > { %v1071_v17 = vmax.f32 %v982_v12, 0.0  ;;  %v1110_v30 = vpack.c.bf16 %v1070_v51, %v1068_v59  ;;  %v986_v57 = vadd.f32 %v985_v54, %v3843_v53 }
 0x2b5   : > { %v987_v50 = vpop.f32.mrf.mxu0 }
 0x2b6   : > { %v1111_v18 = vpack.c.bf16 %v1071_v17, %v1069_v31  ;;  %v988_v6 = vadd.f32 %v987_v50, %v3840_v44  ;;  %v1072_v29 = vmax.f32 %v986_v57, 0.0 }
 0x2b7   : > { %v989_v56 = vpop.f32.mrf.mxu0 }
 0x2b8   : > { %v990_v20 = vadd.f32 %v989_v56, %v3843_v53  ;;  %1372 = vmatprep.mubr.bf16.mxu1 %v1111_v18  ;;  %v1073_v33 = vmax.f32 %v988_v6, 0.0 }
 0x2b9   : > { %v991_v7 = vpop.f32.mrf.mxu0  ;;  %1373 = vmatmul.mubr.bf16.gmra.mxu1 %v1110_v30 }
 0x2ba   : > { %v992_v1 = vadd.f32 %v991_v7, %v3840_v44  ;;  %v1074_v49 = vmax.f32 %v990_v20, 0.0 }
 0x2bb   : > { %v995_v21 = vpop.f32.mrf.mxu0 }
 0x2bc   : > { %v1075_v2 = vmax.f32 %v992_v1, 0.0  ;;  %v1112_v8 = vpack.c.bf16 %v1074_v49, %v1072_v29  ;;  %v996_v47 = vadd.f32 %v995_v21, %v3843_v53 }
 0x2bd   : > { %v997_v4 = vpop.f32.mrf.mxu0 }
 0x2be   : > { %v1113_v14 = vpack.c.bf16 %v1075_v2, %v1073_v33  ;;  %v998_v0 = vadd.f32 %v997_v4, %v3840_v44  ;;  %v1076_v17 = vmax.f32 %v996_v47, 0.0 }
 0x2bf   : > { %v999_v10 = vpop.f32.mrf.mxu0 }
 0x2c0   : > { %v1000_v16 = vadd.f32 %v999_v10, %v3843_v53  ;;  %1380 = vmatprep.mubr.bf16.mxu1 %v1113_v14  ;;  %v1077_v54 = vmax.f32 %v998_v0, 0.0 }
 0x2c1   : > { %v1001_v42 = vpop.f32.mrf.mxu0  ;;  %1381 = vmatmul.mubr.bf16.gmra.mxu1 %v1112_v8 }
 0x2c2   : > { %v1002_v40 = vadd.f32 %v1001_v42, %v3840_v44  ;;  %v1078_v12 = vmax.f32 %v1000_v16, 0.0 }
 0x2c3   : > { %v1005_v51 = vpop.f32.mrf.mxu0 }
 0x2c4   : > { %v1079_v31 = vmax.f32 %v1002_v40, 0.0  ;;  %v1114_v18 = vpack.c.bf16 %v1078_v12, %v1076_v17  ;;  %v1006_v20 = vadd.f32 %v1005_v51, %v3843_v53 }
 0x2c5   : > { %v1007_v59 = vpop.f32.mrf.mxu0 }
 0x2c6   : > { %v1115_v50 = vpack.c.bf16 %v1079_v31, %v1077_v54  ;;  %v1008_v56 = vadd.f32 %v1007_v59, %v3840_v44  ;;  %v1080_v2 = vmax.f32 %v1006_v20, 0.0  ;;  %v1154_v59 = vsub.s32 1, %v3504_v5 }
 0x2c7   : > { %v1009_v30 = vpop.f32.mrf.mxu0 }
 0x2c8   : > { %v1010_v6 = vadd.f32 %v1009_v30, %v3843_v53  ;;  %1388 = vmatprep.mubr.bf16.mxu1 %v1115_v50  ;;  %v1081_v21 = vmax.f32 %v1008_v56, 0.0 }
 0x2c9   : > { %v1011_v57 = vpop.f32.mrf.mxu0  ;;  %1389 = vmatmul.mubr.bf16.gmra.mxu1 %v1114_v18  ;;  %v3913_v18 = vld [vmem:[%s4499_s3] sm:$0xff] }
 0x2ca   : > { %v1012_v7 = vadd.f32 %v1011_v57, %v3840_v44  ;;  %v1082_v1 = vmax.f32 %v1010_v6, 0.0 }
 0x2cb   : > { %v1015_v49 = vpop.f32.mrf.mxu0 }
 0x2cc   : > { %v1083_v33 = vmax.f32 %v1012_v7, 0.0  ;;  %v1116_v14 = vpack.c.bf16 %v1082_v1, %v1080_v2  ;;  %v1016_v16 = vadd.f32 %v1015_v49, %v3843_v53 }
 0x2cd   : > { %v1017_v29 = vpop.f32.mrf.mxu0 }
 0x2ce   : > { %v1117_v4 = vpack.c.bf16 %v1083_v33, %v1081_v21  ;;  %v1018_v10 = vadd.f32 %v1017_v29, %v3840_v44  ;;  %v1084_v54 = vmax.f32 %v1016_v16, 0.0 }
 0x2cf   : > { %v1019_v8 = vpop.f32.mrf.mxu0 }
 0x2d0   : > { %v1020_v0 = vadd.f32 %v1019_v8, %v3843_v53  ;;  %1396 = vmatprep.mubr.bf16.mxu1 %v1117_v4  ;;  %v1085_v12 = vmax.f32 %v1018_v10, 0.0  ;;  %v3916_v53 = vrot.slane %v3913_v18, %v1154_v59 }
 0x2d1   : > { %v1021_v47 = vpop.f32.mrf.mxu0  ;;  %1397 = vmatmul.mubr.bf16.gmra.mxu1 %v1116_v14 }
 0x2d2   : > { %v1022_v42 = vadd.f32 %v1021_v47, %v3840_v44  ;;  %v1086_v40 = vmax.f32 %v1020_v0, 0.0 }
 0x2d4   : > { %v1087_v51 = vmax.f32 %v1022_v42, 0.0  ;;  %v1118_v17 = vpack.c.bf16 %v1086_v40, %v1084_v54 }
 0x2d6   : > { %v1119_v31 = vpack.c.bf16 %v1087_v51, %v1085_v12 }
 0x2d8   : > { %1404 = vmatprep.mubr.bf16.mxu1 %v1119_v31 }
 0x2d9   : > { %1405 = vmatmul.mubr.bf16.gmra.mxu1 %v1118_v17 }
 0x2de   : > { %v2682_v50 = vpop.f32.mrf.mxu1 }
 0x2e0   : > { %v2683_v44 = vpop.f32.mrf.mxu1 }
 0x2e1   : > { %v2684_v30 = vadd.f32 %v2683_v44, %v2682_v50 }
 0x2e2   : > { %v2685_v56 = vpop.f32.mrf.mxu1 }
 0x2e3   : > { %v1287_v6 = vadd.f32 %v2684_v30, %v3916_v53 }
 0x2e4   : > { %v2686_v20 = vpop.f32.mrf.mxu1 }
 0x2e5   : > { %v2687_v57 = vadd.f32 %v2686_v20, %v2685_v56  ;;  %v3920_v7 = vadd.f32 %v1287_v6, %v3548_v39 }
 0x2e6   : > { %v2688_v1 = vpop.f32.mrf.mxu1 }
 0x2e7   : > { %v1290_v49 = vadd.f32 %v2687_v57, %v3916_v53  ;;  %1445 = vadd.xlane.f32.xlu0 %v3920_v7 }
 0x2e8   : > { %v2689_v21 = vpop.f32.mrf.mxu1 }
 0x2e9   : > { %v2690_v33 = vadd.f32 %v2689_v21, %v2688_v1  ;;  %v3925_v2 = vadd.f32 %v1290_v49, %v3551_v41 }
 0x2ea   : > { %v2691_v29 = vpop.f32.mrf.mxu1 }
 0x2eb   : > { %v1295_v4 = vadd.f32 %v2690_v33, %v3916_v53  ;;  %1447 = vadd.xlane.f32.xlu1 %v3925_v2 }
 0x2ec   : > { %v2692_v14 = vpop.f32.mrf.mxu1 }
 0x2ed   : > { %v2693_v8 = vadd.f32 %v2692_v14, %v2691_v29  ;;  %v3930_v39 = vadd.f32 %v1295_v4, %v3573_v24 }
 0x2ee   : > { %v2694_v10 = vpop.f32.mrf.mxu1 }
 0x2ef   : > { %v1298_v0 = vadd.f32 %v2693_v8, %v3916_v53  ;;  %1449 = vadd.xlane.f32.xlu0 %v3930_v39 }
 0x2f0   : > { %v2695_v16 = vpop.f32.mrf.mxu1 }
 0x2f1   : > { %v2696_v47 = vadd.f32 %v2695_v16, %v2694_v10  ;;  %v3935_v41 = vadd.f32 %v1298_v0, %v3576_v38 }
 0x2f2   : > { %v2697_v42 = vpop.f32.mrf.mxu1 }
 0x2f3   : > { %v1303_v40 = vadd.f32 %v2696_v47, %v3916_v53  ;;  %1451 = vadd.xlane.f32.xlu1 %v3935_v41 }
 0x2f4   : > { %v2698_v12 = vpop.f32.mrf.mxu1 }
 0x2f5   : > { %v2699_v51 = vadd.f32 %v2698_v12, %v2697_v42  ;;  %v3940_v24 = vadd.f32 %v1303_v40, %v3598_v35 }
 0x2f6   : > { %v2700_v54 = vpop.f32.mrf.mxu1 }
 0x2f7   : > { %v1306_v31 = vadd.f32 %v2699_v51, %v3916_v53  ;;  %1453 = vadd.xlane.f32.xlu0 %v3940_v24 }
 0x2f8   : > { %v2701_v17 = vpop.f32.mrf.mxu1 }
 0x2f9   : > { %v2702_v59 = vadd.f32 %v2701_v17, %v2700_v54  ;;  %v3945_v38 = vadd.f32 %v1306_v31, %v3601_v61 }
 0x2fa   : > { %v2703_v50 = vpop.f32.mrf.mxu1 }
 0x2fb   : > { %v1311_v44 = vadd.f32 %v2702_v59, %v3916_v53  ;;  %1455 = vadd.xlane.f32.xlu1 %v3945_v38 }
 0x2fc   : > { %v2704_v30 = vpop.f32.mrf.mxu1 }
 0x2fd   : > { %v2705_v56 = vadd.f32 %v2704_v30, %v2703_v50  ;;  %v3950_v35 = vadd.f32 %v1311_v44, %v3624_v13 }
 0x2fe   : > { %v2706_v6 = vpop.f32.mrf.mxu1 }
 0x2ff   : > { %v1314_v20 = vadd.f32 %v2705_v56, %v3916_v53  ;;  %1457 = vadd.xlane.f32.xlu0 %v3950_v35 }
 0x300   : > { %v2707_v57 = vpop.f32.mrf.mxu1 }
 0x301   : > { %v2708_v1 = vadd.f32 %v2707_v57, %v2706_v6  ;;  %v3955_v61 = vadd.f32 %v1314_v20, %v3627_v62 }
 0x302   : > { %v2709_v49 = vpop.f32.mrf.mxu1 }
 0x303   : > { %v1319_v21 = vadd.f32 %v2708_v1, %v3916_v53  ;;  %1459 = vadd.xlane.f32.xlu1 %v3955_v61 }
 0x304   : > { %v2710_v33 = vpop.f32.mrf.mxu1 }
 0x305   : > { %v2711_v29 = vadd.f32 %v2710_v33, %v2709_v49  ;;  %v3960_v13 = vadd.f32 %v1319_v21, %v3638_v43 }
 0x306   : > { %v2712_v4 = vpop.f32.mrf.mxu1 }
 0x307   : > { %v1322_v14 = vadd.f32 %v2711_v29, %v3916_v53  ;;  %1461 = vadd.xlane.f32.xlu0 %v3960_v13 }
 0x308   : > { %v2713_v8 = vpop.f32.mrf.mxu1 }
 0x309   : > { %v2714_v10 = vadd.f32 %v2713_v8, %v2712_v4  ;;  %v3965_v62 = vadd.f32 %v1322_v14, %v3641_v9 }
 0x30a   : > { %v2715_v0 = vpop.f32.mrf.mxu1 }
 0x30b   : > { %v1327_v16 = vadd.f32 %v2714_v10, %v3916_v53  ;;  %1463 = vadd.xlane.f32.xlu1 %v3965_v62 }
 0x30c   : > { %v2716_v47 = vpop.f32.mrf.mxu1 }
 0x30d   : > { %v2717_v42 = vadd.f32 %v2716_v47, %v2715_v0  ;;  %v3970_v43 = vadd.f32 %v1327_v16, %v3651_v34 }
 0x30e   : > { %v2718_v40 = vpop.f32.mrf.mxu1 }
 0x30f   : > { %v1330_v12 = vadd.f32 %v2717_v42, %v3916_v53  ;;  %1465 = vadd.xlane.f32.xlu0 %v3970_v43 }
 0x310   : > { %v2719_v51 = vpop.f32.mrf.mxu1 }
 0x311   : > { %v2720_v54 = vadd.f32 %v2719_v51, %v2718_v40  ;;  %v3975_v9 = vadd.f32 %v1330_v12, %v3654_v55 }
 0x312   : > { %v2721_v31 = vpop.f32.mrf.mxu1 }
 0x313   : > { %v1335_v17 = vadd.f32 %v2720_v54, %v3916_v53  ;;  %1467 = vadd.xlane.f32.xlu1 %v3975_v9 }
 0x314   : > { %v2722_v59 = vpop.f32.mrf.mxu1 }
 0x315   : > { %v2723_v50 = vadd.f32 %v2722_v59, %v2721_v31  ;;  %v3980_v34 = vadd.f32 %v1335_v17, %v3664_v46 }
 0x316   : > { %v2724_v44 = vpop.f32.mrf.mxu1 }
 0x317   : > { %v1338_v30 = vadd.f32 %v2723_v50, %v3916_v53  ;;  %1469 = vadd.xlane.f32.xlu0 %v3980_v34 }
 0x318   : > { %v2725_v56 = vpop.f32.mrf.mxu1 }
 0x319   : > { %v2726_v6 = vadd.f32 %v2725_v56, %v2724_v44  ;;  %v3985_v55 = vadd.f32 %v1338_v30, %v3667_v25 }
 0x31a   : > { %v2727_v20 = vpop.f32.mrf.mxu1 }
 0x31b   : > { %v1343_v57 = vadd.f32 %v2726_v6, %v3916_v53  ;;  %1471 = vadd.xlane.f32.xlu1 %v3985_v55 }
 0x31c   : > { %v2728_v1 = vpop.f32.mrf.mxu1 }
 0x31d   : > { %v2729_v49 = vadd.f32 %v2728_v1, %v2727_v20  ;;  %v3990_v46 = vadd.f32 %v1343_v57, %v3702_v45 }
 0x31e   : > { %v2730_v21 = vpop.f32.mrf.mxu1 }
 0x31f   : > { %v1346_v33 = vadd.f32 %v2729_v49, %v3916_v53  ;;  %1473 = vadd.xlane.f32.xlu0 %v3990_v46 }
 0x320   : > { %v2731_v29 = vpop.f32.mrf.mxu1 }
 0x321   : > { %v2732_v4 = vadd.f32 %v2731_v29, %v2730_v21  ;;  %v3995_v25 = vadd.f32 %v1346_v33, %v3689_v19 }
 0x322   : > { %v2733_v14 = vpop.f32.mrf.mxu1 }
 0x323   : > { %v1351_v8 = vadd.f32 %v2732_v4, %v3916_v53  ;;  %1475 = vadd.xlane.f32.xlu1 %v3995_v25 }
 0x324   : > { %v2734_v10 = vpop.f32.mrf.mxu1 }
 0x325   : > { %v2735_v0 = vadd.f32 %v2734_v10, %v2733_v14  ;;  %v4000_v45 = vadd.f32 %v1351_v8, %v3724_v60 }
 0x326   : > { %v2736_v16 = vpop.f32.mrf.mxu1 }
 0x327   : > { %v1354_v47 = vadd.f32 %v2735_v0, %v3916_v53  ;;  %1477 = vadd.xlane.f32.xlu0 %v4000_v45 }
 0x328   : > { %v2737_v42 = vpop.f32.mrf.mxu1 }
 0x329   : > { %v2738_v40 = vadd.f32 %v2737_v42, %v2736_v16  ;;  %v4005_v19 = vadd.f32 %v1354_v47, %v3714_v22 }
 0x32a   : > { %v2739_v12 = vpop.f32.mrf.mxu1 }
 0x32b   : > { %v1359_v51 = vadd.f32 %v2738_v40, %v3916_v53  ;;  %1479 = vadd.xlane.f32.xlu1 %v4005_v19 }
 0x32c   : > { %v2740_v54 = vpop.f32.mrf.mxu1 }
 0x32d   : > { %v2741_v31 = vadd.f32 %v2740_v54, %v2739_v12  ;;  %v4010_v60 = vadd.f32 %v1359_v51, %v3742_v37 }
 0x32f   : > { %v1362_v17 = vadd.f32 %v2741_v31, %v3916_v53  ;;  %1481 = vadd.xlane.f32.xlu0 %v4010_v60 }
 0x331   : > { %v4015_v59 = vadd.f32 %v1362_v17, %v3739_v26 }
 0x333   : > { %1483 = vadd.xlane.f32.xlu1 %v4015_v59 }
 0x371   : > { %v2742_v22 = vpop.f32.mrf.mxu1 }
 0x373   : > { %v2743_v50 = vpop.f32.mrf.mxu1 }
 0x374   : > { %v2744_v44 = vadd.f32 %v2743_v50, %v2742_v22 }
 0x375   : > { %v2745_v30 = vpop.f32.mrf.mxu1 }
 0x376   : > { %v1367_v56 = vadd.f32 %v2744_v44, %v3916_v53 }
 0x377   : > { %v2746_v6 = vpop.f32.mrf.mxu1 }
 0x378   : > { %v2747_v20 = vadd.f32 %v2746_v6, %v2745_v30  ;;  %v4020_v37 = vadd.f32 %v1367_v56, %v3764_v36 }
 0x379   : > { %v2748_v57 = vpop.f32.mrf.mxu1 }
 0x37a   : > { %v1370_v1 = vadd.f32 %v2747_v20, %v3916_v53  ;;  %1485 = vadd.xlane.f32.xlu0 %v4020_v37 }
 0x37b   : > { %v2749_v26 = vpop.f32.mrf.mxu1 }
 0x37c   : > { %v2750_v49 = vadd.f32 %v2749_v26, %v2748_v57  ;;  %v4025_v21 = vadd.f32 %v1370_v1, %v3767_v27 }
 0x37d   : > { %v2751_v33 = vpop.f32.mrf.mxu1 }
 0x37e   : > { %v1375_v29 = vadd.f32 %v2750_v49, %v3916_v53  ;;  %1487 = vadd.xlane.f32.xlu1 %v4025_v21 }
 0x37f   : > { %v2752_v4 = vpop.f32.mrf.mxu1 }
 0x380   : > { %v2753_v14 = vadd.f32 %v2752_v4, %v2751_v33  ;;  %v4030_v36 = vadd.f32 %v1375_v29, %v3777_v3  ;;  %v1446_v29 = vpop.xlane.xlu0 %1445 }
 0x381   : > { %v2754_v8 = vpop.f32.mrf.mxu1 }
 0x382   : > { %v1378_v10 = vadd.f32 %v2753_v14, %v3916_v53  ;;  %1489 = vadd.xlane.f32.xlu0 %v4030_v36 }
 0x383   : > { %v2755_v0 = vpop.f32.mrf.mxu1 }
 0x384   : > { %v2756_v16 = vadd.f32 %v2755_v0, %v2754_v8  ;;  %v4035_v27 = vadd.f32 %v1378_v10, %v3780_v11  ;;  %v1509_v10 = vmul.f32 0.0078125, %v1446_v29 }
 0x385   : > { %v2757_v47 = vpop.f32.mrf.mxu1 }
 0x386   : > { %v1383_v42 = vadd.f32 %v2756_v16, %v3916_v53  ;;  %1491 = vadd.xlane.f32.xlu1 %v4035_v27 }
 0x387   : > { %v2758_v40 = vpop.f32.mrf.mxu1 }
 0x388   : > { %v2759_v12 = vadd.f32 %v2758_v40, %v2757_v47  ;;  %v4040_v3 = vadd.f32 %v1383_v42, %v3790_v48  ;;  %v1450_v47 = vpop.xlane.xlu0 %1449 }
 0x389   : > { %v2760_v51 = vpop.f32.mrf.mxu1 }
 0x38a   : > { %v1386_v54 = vadd.f32 %v2759_v12, %v3916_v53  ;;  %1493 = vadd.xlane.f32.xlu0 %v4040_v3 }
 0x38b   : > { %v2761_v31 = vpop.f32.mrf.mxu1 }
 0x38c   : > { %v2762_v17 = vadd.f32 %v2761_v31, %v2760_v51  ;;  %v4045_v11 = vadd.f32 %v1386_v54, %v3793_v15  ;;  %v4070_v51 = vsub.f32 %v3920_v7, %v1509_v10  ;;  %v1511_v54 = vmul.f32 0.0078125, %v1450_v47 }
 0x38d   : > { %v2763_v22 = vpop.f32.mrf.mxu1 }
 0x38e   : > { %v1391_v50 = vadd.f32 %v2762_v17, %v3916_v53  ;;  %1495 = vadd.xlane.f32.xlu1 %v4045_v11 }
 0x38f   : > { %v2764_v44 = vpop.f32.mrf.mxu1 }
 0x390   : > { %v2765_v30 = vadd.f32 %v2764_v44, %v2763_v22  ;;  %v4050_v48 = vadd.f32 %v1391_v50, %v3803_v58  ;;  %v1454_v50 = vpop.xlane.xlu0 %1453 }
 0x391   : > { %v2766_v56 = vpop.f32.mrf.mxu1  ;;  %v1513_v7 = vmul.f32 0.0078125, %v1454_v50 }
 0x392   : > { %v1394_v6 = vadd.f32 %v2765_v30, %v3916_v53  ;;  %1497 = vadd.xlane.f32.xlu0 %v4050_v48 }
 0x393   : > { %v2767_v20 = vpop.f32.mrf.mxu1 }
 0x394   : > { %v2768_v57 = vadd.f32 %v2767_v20, %v2766_v56  ;;  %v4055_v15 = vadd.f32 %v1394_v6, %v3806_v63  ;;  %v1448_v63 = vpop.xlane.xlu1 %1447  ;;  %v4081_v56 = vsub.f32 %v3930_v39, %v1511_v54  ;;  %v4095_v39 = vsub.f32 %v3940_v24, %v1513_v7 }
 0x395   : > { %v2769_v1 = vpop.f32.mrf.mxu1 }
 0x396   : > { %v1399_v26 = vadd.f32 %v2768_v57, %v3916_v53  ;;  %1499 = vadd.xlane.f32.xlu1 %v4055_v15  ;;  %v1458_v57 = vpop.xlane.xlu0 %1457  ;;  %v1577_v10 = vmul.f32 %v4095_v39, %v4095_v39 }
 0x397   : > { %v2770_v49 = vpop.f32.mrf.mxu1 }
 0x398   : > { %v2771_v33 = vadd.f32 %v2770_v49, %v2769_v1  ;;  %v4060_v58 = vadd.f32 %v1399_v26, %v3816_v23  ;;  %v1510_v23 = vmul.f32 0.0078125, %v1448_v63  ;;  %v1452_v31 = vpop.xlane.xlu1 %1451  ;;  %v1515_v26 = vmul.f32 0.0078125, %v1458_v57 }
 0x399   : > { %v2772_v4 = vpop.f32.mrf.mxu1  ;;  %v1512_v30 = vmul.f32 0.0078125, %v1452_v31  ;;  %v1575_v49 = vmul.f32 %v4081_v56, %v4081_v56 }
 0x39a   : > { %v1402_v14 = vadd.f32 %v2771_v33, %v3916_v53  ;;  %1501 = vadd.xlane.f32.xlu0 %v4060_v58  ;;  %v4078_v44 = vsub.f32 %v3925_v2, %v1510_v23  ;;  %v1462_v33 = vpop.xlane.xlu0 %1461 }
 0x39b   : > { %v2773_v8 = vpop.f32.mrf.mxu1  ;;  %v1517_v24 = vmul.f32 0.0078125, %v1462_v33 }
 0x39c   : > { %v2774_v0 = vadd.f32 %v2773_v8, %v2772_v4  ;;  %v4065_v16 = vadd.f32 %v1402_v14, %v3819_v32  ;;  %v1456_v6 = vpop.xlane.xlu1 %1455  ;;  %v1574_v2 = vmul.f32 %v4078_v44, %v4078_v44  ;;  %v4105_v14 = vsub.f32 %v3950_v35, %v1515_v26 }
 0x39d   : > { %v2775_v42 = vpop.f32.mrf.mxu1  ;;  %v1514_v1 = vmul.f32 0.0078125, %v1456_v6 }
 0x39e   : > { %v1407_v40 = vadd.f32 %v2774_v0, %v3916_v53  ;;  %1503 = vadd.xlane.f32.xlu1 %v4065_v16  ;;  %v1466_v63 = vpop.xlane.xlu0 %1465  ;;  %v1579_v23 = vmul.f32 %v4105_v14, %v4105_v14 }
 0x39f   : > { %v2776_v12 = vpop.f32.mrf.mxu1  ;;  %v4102_v4 = vsub.f32 %v3945_v38, %v1514_v1  ;;  %v1519_v38 = vmul.f32 0.0078125, %v1466_v63 }
 0x3a0   : > { %v2777_v17 = vadd.f32 %v2776_v12, %v2775_v42  ;;  %v4073_v22 = vadd.f32 %v1407_v40, %v3829_v28  ;;  %v1573_v28 = vmul.f32 %v4070_v51, %v4070_v51  ;;  %v4113_v42 = vsub.f32 %v3960_v13, %v1517_v24 }
 0x3a1   : > { %v1578_v35 = vmul.f32 %v4102_v4, %v4102_v4  ;;  %v4125_v13 = vsub.f32 %v3970_v43, %v1519_v38 }
 0x3a2   : > { %v1410_v32 = vadd.f32 %v2777_v17, %v3916_v53  ;;  %1505 = vadd.xlane.f32.xlu0 %v4073_v22  ;;  %v4090_v53 = vsub.f32 %v3935_v41, %v1512_v30  ;;  %v1470_v12 = vpop.xlane.xlu0 %1469 }
 0x3a3   : > { %v1521_v17 = vmul.f32 0.0078125, %v1470_v12 }
 0x3a4   : > { %v4084_v20 = vadd.f32 %v1410_v32, %v3832_v52  ;;  %v1460_v52 = vpop.xlane.xlu1 %1459  ;;  %v1576_v41 = vmul.f32 %v4090_v53, %v4090_v53  ;;  %v1581_v32 = vmul.f32 %v4113_v42, %v4113_v42 }
 0x3a5   : > { %v1516_v29 = vmul.f32 0.0078125, %v1460_v52 }
 0x3a6   : > { %1507 = vadd.xlane.f32.xlu1 %v4084_v20  ;;  %1605 = vadd.xlane.f32.xlu0 %v1573_v28  ;;  %v4135_v28 = vsub.f32 %v3980_v34, %v1521_v17 }
 0x3a7   : > { %v4110_v0 = vsub.f32 %v3955_v61, %v1516_v29 }
 0x3a8   : > { %v1464_v8 = vpop.xlane.xlu1 %1463  ;;  %v1474_v30 = vpop.xlane.xlu0 %1473  ;;  %v1585_v33 = vmul.f32 %v4135_v28, %v4135_v28 }
 0x3a9   : > { %v1518_v47 = vmul.f32 0.0078125, %v1464_v8  ;;  %v1580_v61 = vmul.f32 %v4110_v0, %v4110_v0  ;;  %v1523_v43 = vmul.f32 0.0078125, %v1474_v30 }
 0x3aa   : > { %1607 = vadd.xlane.f32.xlu1 %v1574_v2  ;;  %1609 = vadd.xlane.f32.xlu0 %v1575_v49  ;;  %v1583_v2 = vmul.f32 %v4125_v13, %v4125_v13 }
 0x3ab   : > { %v4120_v54 = vsub.f32 %v3965_v62, %v1518_v47  ;;  %v4143_v49 = vsub.f32 %v3990_v46, %v1523_v43 }
 0x3ac   : > { %v1468_v40 = vpop.xlane.xlu1 %1467 }
 0x3ad   : > { %v1520_v31 = vmul.f32 0.0078125, %v1468_v40  ;;  %v1582_v62 = vmul.f32 %v4120_v54, %v4120_v54  ;;  %v1587_v63 = vmul.f32 %v4143_v49, %v4143_v49 }
 0x3ae   : > { %1611 = vadd.xlane.f32.xlu1 %v1576_v41  ;;  %1613 = vadd.xlane.f32.xlu0 %v1577_v10 }
 0x3af   : > { %v4132_v6 = vsub.f32 %v3975_v9, %v1520_v31 }
 0x3b0   : > { %v1472_v50 = vpop.xlane.xlu1 %1471  ;;  %v1478_v1 = vpop.xlane.xlu0 %1477 }
 0x3b1   : > { %v1522_v7 = vmul.f32 0.0078125, %v1472_v50  ;;  %v1525_v9 = vmul.f32 0.0078125, %v1478_v1  ;;  %v1584_v34 = vmul.f32 %v4132_v6, %v4132_v6 }
 0x3b2   : > { %1615 = vadd.xlane.f32.xlu1 %v1578_v35  ;;  %1617 = vadd.xlane.f32.xlu0 %v1579_v23 }
 0x3b3   : > { %v4140_v26 = vsub.f32 %v3985_v55, %v1522_v7  ;;  %v4155_v46 = vsub.f32 %v4000_v45, %v1525_v9 }
 0x3b4   : > { %v1476_v57 = vpop.xlane.xlu1 %1475 }
 0x3b5   : > { %v1524_v52 = vmul.f32 0.0078125, %v1476_v57  ;;  %v1586_v55 = vmul.f32 %v4140_v26, %v4140_v26  ;;  %v1589_v45 = vmul.f32 %v4155_v46, %v4155_v46 }
 0x3b6   : > { %1619 = vadd.xlane.f32.xlu1 %v1580_v61  ;;  %1621 = vadd.xlane.f32.xlu0 %v1581_v32 }
 0x3b7   : > { %v4150_v24 = vsub.f32 %v3995_v25, %v1524_v52 }
 0x3b8   : > { %v1480_v29 = vpop.xlane.xlu1 %1479  ;;  %v1482_v41 = vpop.xlane.xlu0 %1481 }
 0x3b9   : > { %v1526_v8 = vmul.f32 0.0078125, %v1480_v29  ;;  %v1527_v10 = vmul.f32 0.0078125, %v1482_v41  ;;  %v1588_v38 = vmul.f32 %v4150_v24, %v4150_v24 }
 0x3ba   : > { %1623 = vadd.xlane.f32.xlu1 %v1582_v62  ;;  %1625 = vadd.xlane.f32.xlu0 %v1583_v2 }
 0x3bb   : > { %v4162_v25 = vsub.f32 %v4005_v19, %v1526_v8  ;;  %v4165_v40 = vsub.f32 %v4010_v60, %v1527_v10 }
 0x3bc   : > { %v1484_v47 = vpop.xlane.xlu1 %1483 }
 0x3bd   : > { %v1528_v35 = vmul.f32 0.0078125, %v1484_v47  ;;  %v1590_v12 = vmul.f32 %v4162_v25, %v4162_v25  ;;  %v1591_v61 = vmul.f32 %v4165_v40, %v4165_v40 }
 0x3be   : > { %1627 = vadd.xlane.f32.xlu1 %v1584_v34  ;;  %1629 = vadd.xlane.f32.xlu0 %v1585_v33 }
 0x3bf   : > { %v4170_v23 = vsub.f32 %v4015_v59, %v1528_v35 }
 0x3c1   : > { %v1592_v19 = vmul.f32 %v4170_v23, %v4170_v23 }
 0x3c2   : > { %1631 = vadd.xlane.f32.xlu1 %v1586_v55  ;;  %1633 = vadd.xlane.f32.xlu0 %v1587_v63 }
 0x3c6   : > { %1635 = vadd.xlane.f32.xlu1 %v1588_v38  ;;  %1637 = vadd.xlane.f32.xlu0 %v1589_v45 }
 0x3ca   : > { %1639 = vadd.xlane.f32.xlu1 %v1590_v12  ;;  %1641 = vadd.xlane.f32.xlu0 %v1591_v61 }
 0x3ce   : > { %1643 = vadd.xlane.f32.xlu1 %v1592_v19 }
 0x403   : > { %v1486_v60 = vpop.xlane.xlu0 %1485 }
 0x404   : > { %v1529_v31 = vmul.f32 0.0078125, %v1486_v60 }
 0x406   : > { %v4179_v17 = vsub.f32 %v4020_v37, %v1529_v31 }
 0x407   : > { %v1488_v50 = vpop.xlane.xlu1 %1487 }
 0x408   : > { %v1530_v59 = vmul.f32 0.0078125, %v1488_v50  ;;  %v1593_v32 = vmul.f32 %v4179_v17, %v4179_v17 }
 0x40a   : > { %v4184_v30 = vsub.f32 %v4025_v21, %v1530_v59  ;;  %1645 = vadd.xlane.f32.xlu0 %v1593_v32 }
 0x40b   : > { %v1490_v7 = vpop.xlane.xlu0 %1489 }
 0x40c   : > { %v1531_v62 = vmul.f32 0.0078125, %v1490_v7  ;;  %v1594_v43 = vmul.f32 %v4184_v30, %v4184_v30 }
 0x40e   : > { %v4189_v57 = vsub.f32 %v4030_v36, %v1531_v62  ;;  %1647 = vadd.xlane.f32.xlu1 %v1594_v43 }
 0x40f   : > { %v1492_v37 = vpop.xlane.xlu1 %1491 }
 0x410   : > { %v1532_v2 = vmul.f32 0.0078125, %v1492_v37  ;;  %v1595_v1 = vmul.f32 %v4189_v57, %v4189_v57 }
 0x412   : > { %v4194_v52 = vsub.f32 %v4035_v27, %v1532_v2  ;;  %1649 = vadd.xlane.f32.xlu0 %v1595_v1 }
 0x413   : > { %v1494_v21 = vpop.xlane.xlu0 %1493 }
 0x414   : > { %v1533_v9 = vmul.f32 0.0078125, %v1494_v21  ;;  %v1596_v34 = vmul.f32 %v4194_v52, %v4194_v52 }
 0x416   : > { %v4199_v33 = vsub.f32 %v4040_v3, %v1533_v9  ;;  %1651 = vadd.xlane.f32.xlu1 %v1596_v34 }
 0x417   : > { %v1496_v36 = vpop.xlane.xlu1 %1495 }
 0x418   : > { %v1534_v29 = vmul.f32 0.0078125, %v1496_v36  ;;  %v1597_v41 = vmul.f32 %v4199_v33, %v4199_v33 }
 0x41a   : > { %v4204_v55 = vsub.f32 %v4045_v11, %v1534_v29  ;;  %1653 = vadd.xlane.f32.xlu0 %v1597_v41 }
 0x41b   : > { %v1498_v27 = vpop.xlane.xlu0 %1497 }
 0x41c   : > { %v1535_v8 = vmul.f32 0.0078125, %v1498_v27  ;;  %v1598_v10 = vmul.f32 %v4204_v55, %v4204_v55 }
 0x41e   : > { %v4209_v63 = vsub.f32 %v4050_v48, %v1535_v8  ;;  %1655 = vadd.xlane.f32.xlu1 %v1598_v10 }
 0x41f   : > { %v1500_v3 = vpop.xlane.xlu1 %1499 }
 0x420   : > { %v1536_v47 = vmul.f32 0.0078125, %v1500_v3  ;;  %v1599_v38 = vmul.f32 %v4209_v63, %v4209_v63 }
 0x422   : > { %v4214_v35 = vsub.f32 %v4055_v15, %v1536_v47  ;;  %1657 = vadd.xlane.f32.xlu0 %v1599_v38 }
 0x423   : > { %v1502_v11 = vpop.xlane.xlu0 %1501 }
 0x424   : > { %v1537_v45 = vmul.f32 0.0078125, %v1502_v11  ;;  %v1600_v12 = vmul.f32 %v4214_v35, %v4214_v35 }
 0x426   : > { %v4219_v61 = vsub.f32 %v4060_v58, %v1537_v45  ;;  %1659 = vadd.xlane.f32.xlu1 %v1600_v12  ;;  %v1799_v12 = vsub.s32 4, %v3504_v5 }
 0x427   : > { %v1504_v48 = vpop.xlane.xlu1 %1503 }
 0x428   : > { %v1538_v19 = vmul.f32 0.0078125, %v1504_v48  ;;  %v1601_v60 = vmul.f32 %v4219_v61, %v4219_v61 }
 0x42a   : > { %v4224_v31 = vsub.f32 %v4065_v16, %v1538_v19  ;;  %1661 = vadd.xlane.f32.xlu0 %v1601_v60 }
 0x42b   : > { %v1506_v15 = vpop.xlane.xlu0 %1505 }
 0x42c   : > { %v1539_v50 = vmul.f32 0.0078125, %v1506_v15  ;;  %v1602_v59 = vmul.f32 %v4224_v31, %v4224_v31 }
 0x42e   : > { %v4229_v32 = vsub.f32 %v4073_v22, %v1539_v50  ;;  %1663 = vadd.xlane.f32.xlu1 %v1602_v59 }
 0x42f   : > { %v1508_v58 = vpop.xlane.xlu1 %1507  ;;  %v1606_v7 = vpop.xlane.xlu0 %1605 }
 0x430   : > { %v1540_v62 = vmul.f32 0.0078125, %v1508_v58  ;;  %v1669_v43 = vmul.f32 0.0078125, %v1606_v7  ;;  %v1603_v37 = vmul.f32 %v4229_v32, %v4229_v32  ;;  %v4240_v7 = vrot.slane %v3913_v18, %v1799_v12 }
 0x432   : > { %v4234_v16 = vsub.f32 %v4084_v20, %v1540_v62  ;;  %v1701_v2 = vadd.f32 1e-05, %v1669_v43  ;;  %1665 = vadd.xlane.f32.xlu0 %v1603_v37  ;;  %v1835_v62 = vsub.s32 5, %v3504_v5 }
 0x433   : > { %v1608_v1 = vpop.xlane.xlu1 %1607  ;;  %v1610_v21 = vpop.xlane.xlu0 %1609 }
 0x434   : > { %2971 = vrsqrt.f32 %v1701_v2  ;;  %v1670_v9 = vmul.f32 0.0078125, %v1608_v1  ;;  %v1671_v34 = vmul.f32 0.0078125, %v1610_v21  ;;  %v1604_v22 = vmul.f32 %v4234_v16, %v4234_v16 }
 0x436   : > { %v1702_v36 = vadd.f32 1e-05, %v1670_v9  ;;  %v1703_v29 = vadd.f32 1e-05, %v1671_v34  ;;  %1667 = vadd.xlane.f32.xlu1 %v1604_v22 }
 0x437   : > { %v1612_v41 = vpop.xlane.xlu1 %1611  ;;  %v1614_v27 = vpop.xlane.xlu0 %1613 }
 0x438   : > { %2973 = vrsqrt.f32 %v1702_v36  ;;  %v1672_v8 = vmul.f32 0.0078125, %v1612_v41  ;;  %v1673_v10 = vmul.f32 0.0078125, %v1614_v27  ;;  %v4245_v36 = vrot.slane %v3913_v18, %v1835_v62 }
 0x439   : > { %2975 = vrsqrt.f32 %v1703_v29 }
 0x43a   : > { %v1704_v20 = vadd.f32 1e-05, %v1672_v8  ;;  %v1705_v3 = vadd.f32 1e-05, %v1673_v10 }
 0x43b   : > { %v1616_v47 = vpop.xlane.xlu1 %1615  ;;  %v1618_v38 = vpop.xlane.xlu0 %1617 }
 0x43c   : > { %2977 = vrsqrt.f32 %v1704_v20  ;;  %v1674_v11 = vmul.f32 0.0078125, %v1616_v47  ;;  %v1675_v45 = vmul.f32 0.0078125, %v1618_v38 }
 0x43d   : > { %2979 = vrsqrt.f32 %v1705_v3 }
 0x43e   : > { %v1706_v48 = vadd.f32 1e-05, %v1674_v11  ;;  %v1707_v19 = vadd.f32 1e-05, %v1675_v45 }
 0x43f   : > { %v1620_v60 = vpop.xlane.xlu1 %1619  ;;  %v1622_v15 = vpop.xlane.xlu0 %1621 }
 0x440   : > { %2981 = vrsqrt.f32 %v1706_v48  ;;  %v1676_v50 = vmul.f32 0.0078125, %v1620_v60  ;;  %v1677_v59 = vmul.f32 0.0078125, %v1622_v15 }
 0x441   : > { %v2972_v58 = vpop.eup %2971  ;;  %2983 = vrsqrt.f32 %v1707_v19 }
 0x442   : > { %v1765_v43 = vmul.f32 %v2972_v58, %v4070_v51  ;;  %v1708_v37 = vadd.f32 1e-05, %v1676_v50  ;;  %v1709_v2 = vadd.f32 1e-05, %v1677_v59 }
 0x443   : > { %v1624_v1 = vpop.xlane.xlu1 %1623  ;;  %v1626_v21 = vpop.xlane.xlu0 %1625 }
 0x444   : > { %2985 = vrsqrt.f32 %v1708_v37  ;;  %v1678_v9 = vmul.f32 0.0078125, %v1624_v1  ;;  %v1679_v34 = vmul.f32 0.0078125, %v1626_v21  ;;  %v1801_v29 = vmul.f32 %v4240_v7, %v1765_v43 }
 0x445   : > { %v2974_v22 = vpop.eup %2973  ;;  %2987 = vrsqrt.f32 %v1709_v2 }
 0x446   : > { %v2976_v41 = vpop.eup %2975  ;;  %v1766_v5 = vmul.f32 %v2974_v22, %v4078_v44  ;;  %v1710_v27 = vadd.f32 1e-05, %v1678_v9  ;;  %v1711_v51 = vadd.f32 1e-05, %v1679_v34  ;;  %v1837_v11 = vadd.f32 %v4245_v36, %v1801_v29 }
 0x447   : > { %v1767_v8 = vmul.f32 %v2976_v41, %v4081_v56  ;;  %v1628_v10 = vpop.xlane.xlu1 %1627  ;;  %v1630_v20 = vpop.xlane.xlu0 %1629 }
 0x448   : > { %v1802_v3 = vmul.f32 %v4240_v7, %v1766_v5  ;;  %2989 = vrsqrt.f32 %v1710_v27  ;;  %v1680_v47 = vmul.f32 0.0078125, %v1628_v10  ;;  %v1681_v18 = vmul.f32 0.0078125, %v1630_v20 }
 0x449   : > { %v2978_v38 = vpop.eup %2977  ;;  %v1803_v45 = vmul.f32 %v4240_v7, %v1767_v8  ;;  %2991 = vrsqrt.f32 %v1711_v51 }
 0x44a   : > { %v2980_v12 = vpop.eup %2979  ;;  %v1838_v44 = vadd.f32 %v4245_v36, %v1802_v3  ;;  %v1768_v48 = vmul.f32 %v2978_v38, %v4090_v53  ;;  %v1712_v56 = vadd.f32 1e-05, %v1680_v47  ;;  %v1713_v19 = vadd.f32 1e-05, %v1681_v18 }
 0x44b   : > { %v1769_v60 = vmul.f32 %v2980_v12, %v4095_v39  ;;  %v1632_v15 = vpop.xlane.xlu1 %1631  ;;  %v1634_v50 = vpop.xlane.xlu0 %1633  ;;  %v1839_v53 = vadd.f32 %v4245_v36, %v1803_v45 }
 0x44c   : > { %v2559_v59 = vpack.c.bf16 %v1838_v44, %v1837_v11  ;;  %v1804_v58 = vmul.f32 %v4240_v7, %v1768_v48  ;;  %2993 = vrsqrt.f32 %v1712_v56  ;;  %v1682_v62 = vmul.f32 0.0078125, %v1632_v15 }
 0x44d   : > { %v2982_v43 = vpop.eup %2981  ;;  %v1805_v37 = vmul.f32 %v4240_v7, %v1769_v60  ;;  %2995 = vrsqrt.f32 %v1713_v19  ;;  %v1683_v2 = vmul.f32 0.0078125, %v1634_v50 }
 0x44e   : > { %v2984_v1 = vpop.eup %2983  ;;  %2560 = vst [vmem:[%s4259_s15] sm:$0xff] %v2559_v59   ;;  %v1840_v39 = vadd.f32 %v4245_v36, %v1804_v58  ;;  %v1770_v21 = vmul.f32 %v2982_v43, %v4102_v4  ;;  %v1714_v9 = vadd.f32 1e-05, %v1682_v62 }
 0x44f   : > { %v1771_v34 = vmul.f32 %v2984_v1, %v4105_v14  ;;  %v1715_v22 = vadd.f32 1e-05, %v1683_v2  ;;  %v1636_v29 = vpop.xlane.xlu1 %1635  ;;  %v1638_v41 = vpop.xlane.xlu0 %1637  ;;  %v1841_v10 = vadd.f32 %v4245_v36, %v1805_v37 }
 0x450   : > { %v2564_v5 = vpack.c.bf16 %v1840_v39, %v1839_v53  ;;  %v1806_v27 = vmul.f32 %v4240_v7, %v1770_v21  ;;  %2997 = vrsqrt.f32 %v1714_v9  ;;  %v1684_v51 = vmul.f32 0.0078125, %v1636_v29 }
 0x451   : > { %v2986_v8 = vpop.eup %2985  ;;  %2999 = vrsqrt.f32 %v1715_v22  ;;  %v1685_v20 = vmul.f32 0.0078125, %v1638_v41  ;;  %v1807_v47 = vmul.f32 %v4240_v7, %v1771_v34 }
 0x452   : > { %v2988_v3 = vpop.eup %2987  ;;  %2651 = vst [vmem:[%s4259_s15 + $0x8] sm:$0xff] %v2564_v5   ;;  %v1842_v4 = vadd.f32 %v4245_v36, %v1806_v27  ;;  %v1772_v14 = vmul.f32 %v2986_v8, %v4110_v0  ;;  %v1716_v18 = vadd.f32 1e-05, %v1684_v51 }
 0x453   : > { %v1773_v38 = vmul.f32 %v2988_v3, %v4113_v42  ;;  %v1717_v11 = vadd.f32 1e-05, %v1685_v20  ;;  %v1640_v45 = vpop.xlane.xlu1 %1639  ;;  %v1642_v12 = vpop.xlane.xlu0 %1641  ;;  %v1843_v0 = vadd.f32 %v4245_v36, %v1807_v47 }
 0x454   : > { %v2569_v44 = vpack.c.bf16 %v1842_v4, %v1841_v10  ;;  %v1808_v48 = vmul.f32 %v4240_v7, %v1772_v14  ;;  %3001 = vrsqrt.f32 %v1716_v18  ;;  %v1686_v56 = vmul.f32 0.0078125, %v1640_v45 }
 0x455   : > { %v2990_v19 = vpop.eup %2989  ;;  %v1809_v60 = vmul.f32 %v4240_v7, %v1773_v38  ;;  %3003 = vrsqrt.f32 %v1717_v11  ;;  %v1687_v15 = vmul.f32 0.0078125, %v1642_v12 }
 0x456   : > { %v2992_v50 = vpop.eup %2991  ;;  %2652 = vst [vmem:[%s4259_s15 + $0x10] sm:$0xff] %v2569_v44   ;;  %v1844_v42 = vadd.f32 %v4245_v36, %v1808_v48  ;;  %v1774_v59 = vmul.f32 %v2990_v19, %v4120_v54  ;;  %v1718_v58 = vadd.f32 1e-05, %v1686_v56 }
 0x457   : > { %v1775_v62 = vmul.f32 %v2992_v50, %v4125_v13  ;;  %v1719_v43 = vadd.f32 1e-05, %v1687_v15  ;;  %v1644_v37 = vpop.xlane.xlu1 %1643  ;;  %v1845_v21 = vadd.f32 %v4245_v36, %v1809_v60 }
 0x458   : > { %v2574_v2 = vpack.c.bf16 %v1844_v42, %v1843_v0  ;;  %v1810_v1 = vmul.f32 %v4240_v7, %v1774_v59  ;;  %3005 = vrsqrt.f32 %v1718_v58  ;;  %v1688_v53 = vmul.f32 0.0078125, %v1644_v37 }
 0x459   : > { %v2994_v39 = vpop.eup %2993  ;;  %3007 = vrsqrt.f32 %v1719_v43  ;;  %v1811_v54 = vmul.f32 %v4240_v7, %v1775_v62 }
 0x45a   : > { %v2996_v9 = vpop.eup %2995  ;;  %2653 = vst [vmem:[%s4259_s15 + $0x18] sm:$0xff] %v2574_v2   ;;  %v1846_v34 = vadd.f32 %v4245_v36, %v1810_v1  ;;  %v1776_v13 = vmul.f32 %v2994_v39, %v4132_v6  ;;  %v1720_v22 = vadd.f32 1e-05, %v1688_v53 }
 0x45b   : > { %v1777_v29 = vmul.f32 %v2996_v9, %v4135_v28  ;;  %v1847_v8 = vadd.f32 %v4245_v36, %v1811_v54 }
 0x45c   : > { %v2579_v41 = vpack.c.bf16 %v1846_v34, %v1845_v21  ;;  %v1812_v5 = vmul.f32 %v4240_v7, %v1776_v13  ;;  %3009 = vrsqrt.f32 %v1720_v22 }
 0x45d   : > { %v2998_v27 = vpop.eup %2997  ;;  %v1813_v20 = vmul.f32 %v4240_v7, %v1777_v29 }
 0x45e   : > { %v3000_v51 = vpop.eup %2999  ;;  %2654 = vst [vmem:[%s4259_s15 + $0x20] sm:$0xff] %v2579_v41   ;;  %v1848_v10 = vadd.f32 %v4245_v36, %v1812_v5  ;;  %v1778_v3 = vmul.f32 %v2998_v27, %v4140_v26 }
 0x45f   : > { %v1779_v6 = vmul.f32 %v3000_v51, %v4143_v49  ;;  %v1849_v18 = vadd.f32 %v4245_v36, %v1813_v20 }
 0x460   : > { %v2584_v28 = vpack.c.bf16 %v1848_v10, %v1847_v8  ;;  %v1814_v4 = vmul.f32 %v4240_v7, %v1778_v3 }
 0x461   : > { %v3002_v47 = vpop.eup %3001  ;;  %v1815_v11 = vmul.f32 %v4240_v7, %v1779_v6 }
 0x462   : > { %v3004_v14 = vpop.eup %3003  ;;  %2655 = vst [vmem:[%s4259_s15 + $0x28] sm:$0xff] %v2584_v28   ;;  %v1850_v38 = vadd.f32 %v4245_v36, %v1814_v4  ;;  %v1780_v45 = vmul.f32 %v3002_v47, %v4150_v24 }
 0x463   : > { %v1781_v26 = vmul.f32 %v3004_v14, %v4155_v46  ;;  %v1851_v56 = vadd.f32 %v4245_v36, %v1815_v11 }
 0x464   : > { %v2589_v12 = vpack.c.bf16 %v1850_v38, %v1849_v18  ;;  %v1816_v49 = vmul.f32 %v4240_v7, %v1780_v45 }
 0x465   : > { %v3006_v44 = vpop.eup %3005  ;;  %v1817_v60 = vmul.f32 %v4240_v7, %v1781_v26 }
 0x466   : > { %v3008_v48 = vpop.eup %3007  ;;  %2656 = vst [vmem:[%s4259_s15 + $0x30] sm:$0xff] %v2589_v12   ;;  %v1852_v19 = vadd.f32 %v4245_v36, %v1816_v49  ;;  %v1782_v15 = vmul.f32 %v3006_v44, %v4162_v25 }
 0x467   : > { %v1783_v24 = vmul.f32 %v3008_v48, %v4165_v40  ;;  %v1853_v42 = vadd.f32 %v4245_v36, %v1817_v60 }
 0x468   : > { %v2594_v50 = vpack.c.bf16 %v1852_v19, %v1851_v56  ;;  %v1818_v46 = vmul.f32 %v4240_v7, %v1782_v15 }
 0x469   : > { %v3010_v0 = vpop.eup %3009  ;;  %v1819_v58 = vmul.f32 %v4240_v7, %v1783_v24 }
 0x46a   : > { %2657 = vst [vmem:[%s4259_s15 + $0x38] sm:$0xff] %v2594_v50   ;;  %v1854_v59 = vadd.f32 %v4245_v36, %v1818_v46  ;;  %v1784_v62 = vmul.f32 %v3010_v0, %v4170_v23 }
 0x46b   : > { %v1855_v25 = vadd.f32 %v4245_v36, %v1819_v58 }
 0x46c   : > { %v2599_v43 = vpack.c.bf16 %v1854_v59, %v1853_v42  ;;  %v1820_v37 = vmul.f32 %v4240_v7, %v1784_v62 }
 0x46e   : > { %2658 = vst [vmem:[%s4259_s15 + $0x40] sm:$0xff] %v2599_v43   ;;  %v1856_v40 = vadd.f32 %v4245_v36, %v1820_v37 }
 0x470   : > { %v2604_v2 = vpack.c.bf16 %v1856_v40, %v1855_v25 }
 0x472   : > { %2659 = vst [vmem:[%s4259_s15 + $0x48] sm:$0xff] %v2604_v2  }
 0x493   : > { %v1646_v1 = vpop.xlane.xlu0 %1645 }
 0x494   : > { %v1689_v53 = vmul.f32 0.0078125, %v1646_v1 }
 0x496   : > { %v1721_v39 = vadd.f32 1e-05, %v1689_v53 }
 0x497   : > { %v1648_v21 = vpop.xlane.xlu1 %1647 }
 0x498   : > { %3011 = vrsqrt.f32 %v1721_v39  ;;  %v1690_v9 = vmul.f32 0.0078125, %v1648_v21 }
 0x49a   : > { %v1722_v34 = vadd.f32 1e-05, %v1690_v9 }
 0x49b   : > { %v1650_v54 = vpop.xlane.xlu0 %1649 }
 0x49c   : > { %3013 = vrsqrt.f32 %v1722_v34  ;;  %v1691_v23 = vmul.f32 0.0078125, %v1650_v54 }
 0x49e   : > { %v1723_v13 = vadd.f32 1e-05, %v1691_v23 }
 0x49f   : > { %v1652_v22 = vpop.xlane.xlu1 %1651 }
 0x4a0   : > { %3015 = vrsqrt.f32 %v1723_v13  ;;  %v1692_v29 = vmul.f32 0.0078125, %v1652_v22 }
 0x4a2   : > { %v1724_v41 = vadd.f32 1e-05, %v1692_v29 }
 0x4a3   : > { %v1654_v5 = vpop.xlane.xlu0 %1653 }
 0x4a4   : > { %3017 = vrsqrt.f32 %v1724_v41  ;;  %v1693_v27 = vmul.f32 0.0078125, %v1654_v5 }
 0x4a5   : > { %v3012_v51 = vpop.eup %3011 }
 0x4a6   : > { %v1785_v8 = vmul.f32 %v3012_v51, %v4179_v17  ;;  %v1725_v10 = vadd.f32 1e-05, %v1693_v27 }
 0x4a7   : > { %v1656_v20 = vpop.xlane.xlu1 %1655 }
 0x4a8   : > { %3019 = vrsqrt.f32 %v1725_v10  ;;  %v1694_v3 = vmul.f32 0.0078125, %v1656_v20  ;;  %v1821_v28 = vmul.f32 %v4240_v7, %v1785_v8 }
 0x4a9   : > { %v3014_v6 = vpop.eup %3013 }
 0x4aa   : > { %v1786_v4 = vmul.f32 %v3014_v6, %v4184_v30  ;;  %v1726_v47 = vadd.f32 1e-05, %v1694_v3  ;;  %v1857_v45 = vadd.f32 %v4245_v36, %v1821_v28 }
 0x4ab   : > { %v1658_v14 = vpop.xlane.xlu0 %1657 }
 0x4ac   : > { %v1822_v18 = vmul.f32 %v4240_v7, %v1786_v4  ;;  %3021 = vrsqrt.f32 %v1726_v47  ;;  %v1695_v38 = vmul.f32 0.0078125, %v1658_v14 }
 0x4ad   : > { %v3016_v11 = vpop.eup %3015 }
 0x4ae   : > { %v1858_v17 = vadd.f32 %v4245_v36, %v1822_v18  ;;  %v1787_v26 = vmul.f32 %v3016_v11, %v4189_v57  ;;  %v1727_v12 = vadd.f32 1e-05, %v1695_v38 }
 0x4af   : > { %v1660_v49 = vpop.xlane.xlu1 %1659 }
 0x4b0   : > { %v2609_v44 = vpack.c.bf16 %v1858_v17, %v1857_v45  ;;  %3023 = vrsqrt.f32 %v1727_v12  ;;  %v1696_v48 = vmul.f32 0.0078125, %v1660_v49  ;;  %v1823_v56 = vmul.f32 %v4240_v7, %v1787_v26 }
 0x4b1   : > { %v3018_v30 = vpop.eup %3017 }
 0x4b2   : > { %2660 = vst [vmem:[%s4259_s15 + $0x50] sm:$0xff] %v2609_v44   ;;  %v1788_v19 = vmul.f32 %v3018_v30, %v4194_v52  ;;  %v1728_v60 = vadd.f32 1e-05, %v1696_v48  ;;  %v1859_v57 = vadd.f32 %v4245_v36, %v1823_v56 }
 0x4b3   : > { %v1662_v15 = vpop.xlane.xlu0 %1661 }
 0x4b4   : > { %v1824_v24 = vmul.f32 %v4240_v7, %v1788_v19  ;;  %3025 = vrsqrt.f32 %v1728_v60  ;;  %v1697_v50 = vmul.f32 0.0078125, %v1662_v15 }
 0x4b5   : > { %v3020_v46 = vpop.eup %3019 }
 0x4b6   : > { %v1860_v0 = vadd.f32 %v4245_v36, %v1824_v24  ;;  %v1789_v42 = vmul.f32 %v3020_v46, %v4199_v33  ;;  %v1729_v59 = vadd.f32 1e-05, %v1697_v50 }
 0x4b7   : > { %v1664_v58 = vpop.xlane.xlu1 %1663 }
 0x4b8   : > { %v2614_v62 = vpack.c.bf16 %v1860_v0, %v1859_v57  ;;  %3027 = vrsqrt.f32 %v1729_v59  ;;  %v1698_v43 = vmul.f32 0.0078125, %v1664_v58  ;;  %v1825_v37 = vmul.f32 %v4240_v7, %v1789_v42 }
 0x4b9   : > { %v3022_v52 = vpop.eup %3021 }
 0x4ba   : > { %2661 = vst [vmem:[%s4259_s15 + $0x58] sm:$0xff] %v2614_v62   ;;  %v1790_v25 = vmul.f32 %v3022_v52, %v4204_v55  ;;  %v1730_v40 = vadd.f32 1e-05, %v1698_v43  ;;  %v1861_v33 = vadd.f32 %v4245_v36, %v1825_v37 }
 0x4bb   : > { %v1666_v2 = vpop.xlane.xlu0 %1665 }
 0x4bc   : > { %v1826_v1 = vmul.f32 %v4240_v7, %v1790_v25  ;;  %3029 = vrsqrt.f32 %v1730_v40  ;;  %v1699_v53 = vmul.f32 0.0078125, %v1666_v2 }
 0x4bd   : > { %v3024_v39 = vpop.eup %3023 }
 0x4be   : > { %v1862_v21 = vadd.f32 %v4245_v36, %v1826_v1  ;;  %v1791_v9 = vmul.f32 %v3024_v39, %v4209_v63  ;;  %v1731_v34 = vadd.f32 1e-05, %v1699_v53 }
 0x4bf   : > { %v1668_v54 = vpop.xlane.xlu1 %1667 }
 0x4c0   : > { %v2619_v23 = vpack.c.bf16 %v1862_v21, %v1861_v33  ;;  %3031 = vrsqrt.f32 %v1731_v34  ;;  %v1700_v55 = vmul.f32 0.0078125, %v1668_v54  ;;  %v1827_v22 = vmul.f32 %v4240_v7, %v1791_v9 }
 0x4c1   : > { %v3026_v13 = vpop.eup %3025 }
 0x4c2   : > { %2662 = vst [vmem:[%s4259_s15 + $0x60] sm:$0xff] %v2619_v23   ;;  %v1792_v29 = vmul.f32 %v3026_v13, %v4214_v35  ;;  %v1732_v41 = vadd.f32 1e-05, %v1700_v55  ;;  %v1863_v63 = vadd.f32 %v4245_v36, %v1827_v22 }
 0x4c4   : > { %v1828_v5 = vmul.f32 %v4240_v7, %v1792_v29  ;;  %3033 = vrsqrt.f32 %v1732_v41 }
 0x4c5   : > { %v3028_v27 = vpop.eup %3027 }
 0x4c6   : > { %v1864_v51 = vadd.f32 %v4245_v36, %v1828_v5  ;;  %v1793_v8 = vmul.f32 %v3028_v27, %v4219_v61 }
 0x4c8   : > { %v2624_v10 = vpack.c.bf16 %v1864_v51, %v1863_v63  ;;  %v1829_v3 = vmul.f32 %v4240_v7, %v1793_v8 }
 0x4c9   : > { %v3030_v20 = vpop.eup %3029 }
 0x4ca   : > { %2663 = vst [vmem:[%s4259_s15 + $0x68] sm:$0xff] %v2624_v10   ;;  %v1794_v35 = vmul.f32 %v3030_v20, %v4224_v31  ;;  %v1865_v4 = vadd.f32 %v4245_v36, %v1829_v3 }
 0x4cc   : > { %v1830_v6 = vmul.f32 %v4240_v7, %v1794_v35 }
 0x4cd   : > { %v3032_v28 = vpop.eup %3031 }
 0x4ce   : > { %v1866_v47 = vadd.f32 %v4245_v36, %v1830_v6  ;;  %v1795_v14 = vmul.f32 %v3032_v28, %v4229_v32 }
 0x4d0   : > { %v2629_v18 = vpack.c.bf16 %v1866_v47, %v1865_v4  ;;  %v1831_v61 = vmul.f32 %v4240_v7, %v1795_v14 }
 0x4d1   : > { %v3034_v38 = vpop.eup %3033 }
 0x4d2   : > { %2664 = vst [vmem:[%s4259_s15 + $0x70] sm:$0xff] %v2629_v18   ;;  %v1796_v11 = vmul.f32 %v3034_v38, %v4234_v16  ;;  %v1867_v31 = vadd.f32 %v4245_v36, %v1831_v61 }
 0x4d4   : > { %v1832_v45 = vmul.f32 %v4240_v7, %v1796_v11 }
 0x4d6   : > { %v1868_v17 = vadd.f32 %v4245_v36, %v1832_v45  ;;  %2035 = sbr.rel (!%p3175_p4) target bundleno = 1303 (0x517), region = 40 }
 0x4d8   : > { %v2634_v26 = vpack.c.bf16 %v1868_v17, %v1867_v31 }
 0x4da   : > { %2665 = vst [vmem:[%s4259_s15 + $0x78] sm:$0xff] %v2634_v26  }
 0x4db   : > { %s4509_s26 = smov (!%p2038_p8, %s2037_s26), 32 }
 0x4dc   : > { %s2442_s6 = sshll.u32 %s4509_s26, 6 }
 0x4dd   : > { %p2445_p9 = scmp.eq.s32.totalorder %s2442_s6, 0 }
 0x4de   : > { %s4374_s7 = sshrl.u32 (!%p2445_p9), %s4509_s26, 5 }
 0x4df   : > { %2046 = sbr.rel (%p2445_p9) target bundleno = 1303 (0x517), region = 44  ;;  %p2446_p10 = scmp.le.s32.totalorder (!%p2445_p9), %s4374_s7, 0 }
 0x4e4   : > { %2325 = sbr.rel (%p2446_p10) target bundleno = 1286 (0x506), region = 116  ;;  %s4502_s18 = smov (!%p2446_p10), %s4368_s5 }
 0x4e5   : > { %s4503_s23 = smov (!%p2446_p10), %s4259_s15  ;;  %s4383_s24 = smov (!%p2446_p10), 0  }
 0x4e6   : > { %s4385_s8 = smov (!%p2446_p10), 0  }
 0x4e9 LB: >> { %v2063_v32 = vld [vmem:[%s3098_s23] sm:$0xf]  ;;  %v2065_v16 = vld [vmem:[%s3098_s23 + $0x4] sm:$0xf]  ;;  %v2067_v7 = vld [vmem:[%s3098_s23 + $0x8] sm:$0xf]  ;;  %s3106_s8 = sphi %s4385_s8, %s2057_s8   ;;  %s3102_s24 = sphi %s4383_s24, %s4504_s24   ;;  %s3098_s23 = sphi %s4503_s23, %s2132_s23   ;;  %s3094_s18 = sphi %s4502_s18, %s2133_s18  }
 0x4ea   : >> { %2064 = vst [vmem:[%s3094_s18] sm:$0xf] %v2063_v32  ;;  %2066 = vst [vmem:[%s3094_s18 + $0x4] sm:$0xf] %v2065_v16  ;;  %v2069_v36 = vld [vmem:[%s3098_s23 + $0xc] sm:$0xf]  ;;  %s2127_s9 = sadd.s32 1, %s3102_s24 }
 0x4eb   : >> { %2068 = vst [vmem:[%s3094_s18 + $0x8] sm:$0xf] %v2067_v7  ;;  %v2071_v12 = vld [vmem:[%s3098_s23 + $0x10] sm:$0xf]  ;;  %v2073_v49 = vld [vmem:[%s3098_s23 + $0x14] sm:$0xf]  ;;  %p2128_p11 = scmp.ge.s32.totalorder %s2127_s9, %s4374_s7 }
 0x4ec   : >> { %2070 = vst [vmem:[%s3094_s18 + $0xc] sm:$0xf] %v2069_v36  ;;  %2072 = vst [vmem:[%s3094_s18 + $0x10] sm:$0xf] %v2071_v12  ;;  %v2075_v44 = vld [vmem:[%s3098_s23 + $0x18] sm:$0xf] }
 0x4ed   : >> { %2074 = vst [vmem:[%s3094_s18 + $0x14] sm:$0xf] %v2073_v49  ;;  %v2077_v48 = vld [vmem:[%s3098_s23 + $0x1c] sm:$0xf]  ;;  %v2079_v30 = vld [vmem:[%s3098_s23 + $0x20] sm:$0xf] }
 0x4ee   : >> { %2076 = vst [vmem:[%s3094_s18 + $0x18] sm:$0xf] %v2075_v44  ;;  %2078 = vst [vmem:[%s3094_s18 + $0x1c] sm:$0xf] %v2077_v48  ;;  %v2081_v56 = vld [vmem:[%s3098_s23 + $0x24] sm:$0xf] }
 0x4ef   : >> { %2080 = vst [vmem:[%s3094_s18 + $0x20] sm:$0xf] %v2079_v30  ;;  %v2083_v19 = vld [vmem:[%s3098_s23 + $0x28] sm:$0xf]  ;;  %v2085_v60 = vld [vmem:[%s3098_s23 + $0x2c] sm:$0xf] }
 0x4f0   : >> { %2082 = vst [vmem:[%s3094_s18 + $0x24] sm:$0xf] %v2081_v56  ;;  %2084 = vst [vmem:[%s3094_s18 + $0x28] sm:$0xf] %v2083_v19  ;;  %v2087_v15 = vld [vmem:[%s3098_s23 + $0x30] sm:$0xf] }
 0x4f1   : >> { %2086 = vst [vmem:[%s3094_s18 + $0x2c] sm:$0xf] %v2085_v60  ;;  %v2089_v24 = vld [vmem:[%s3098_s23 + $0x34] sm:$0xf]  ;;  %v2091_v50 = vld [vmem:[%s3098_s23 + $0x38] sm:$0xf] }
 0x4f2   : >> { %2088 = vst [vmem:[%s3094_s18 + $0x30] sm:$0xf] %v2087_v15  ;;  %2090 = vst [vmem:[%s3094_s18 + $0x34] sm:$0xf] %v2089_v24  ;;  %v2093_v46 = vld [vmem:[%s3098_s23 + $0x3c] sm:$0xf] }
 0x4f3   : >> { %2092 = vst [vmem:[%s3094_s18 + $0x38] sm:$0xf] %v2091_v50  ;;  %v2095_v57 = vld [vmem:[%s3098_s23 + $0x40] sm:$0xf]  ;;  %v2097_v0 = vld [vmem:[%s3098_s23 + $0x44] sm:$0xf] }
 0x4f4   : >> { %2094 = vst [vmem:[%s3094_s18 + $0x3c] sm:$0xf] %v2093_v46  ;;  %2096 = vst [vmem:[%s3094_s18 + $0x40] sm:$0xf] %v2095_v57  ;;  %v2099_v42 = vld [vmem:[%s3098_s23 + $0x48] sm:$0xf] }
 0x4f5   : >> { %2098 = vst [vmem:[%s3094_s18 + $0x44] sm:$0xf] %v2097_v0  ;;  %v2101_v59 = vld [vmem:[%s3098_s23 + $0x4c] sm:$0xf]  ;;  %v2103_v58 = vld [vmem:[%s3098_s23 + $0x50] sm:$0xf] }
 0x4f6   : >> { %2100 = vst [vmem:[%s3094_s18 + $0x48] sm:$0xf] %v2099_v42  ;;  %2102 = vst [vmem:[%s3094_s18 + $0x4c] sm:$0xf] %v2101_v59  ;;  %v2105_v62 = vld [vmem:[%s3098_s23 + $0x54] sm:$0xf] }
 0x4f7   : >> { %2104 = vst [vmem:[%s3094_s18 + $0x50] sm:$0xf] %v2103_v58  ;;  %v2107_v43 = vld [vmem:[%s3098_s23 + $0x58] sm:$0xf]  ;;  %v2109_v52 = vld [vmem:[%s3098_s23 + $0x5c] sm:$0xf] }
 0x4f8   : >> { %2106 = vst [vmem:[%s3094_s18 + $0x54] sm:$0xf] %v2105_v62  ;;  %2108 = vst [vmem:[%s3094_s18 + $0x58] sm:$0xf] %v2107_v43  ;;  %v2111_v37 = vld [vmem:[%s3098_s23 + $0x60] sm:$0xf] }
 0x4f9   : >> { %2110 = vst [vmem:[%s3094_s18 + $0x5c] sm:$0xf] %v2109_v52  ;;  %v2113_v25 = vld [vmem:[%s3098_s23 + $0x64] sm:$0xf]  ;;  %v2115_v40 = vld [vmem:[%s3098_s23 + $0x68] sm:$0xf] }
 0x4fa   : >> { %2112 = vst [vmem:[%s3094_s18 + $0x60] sm:$0xf] %v2111_v37  ;;  %2114 = vst [vmem:[%s3094_s18 + $0x64] sm:$0xf] %v2113_v25  ;;  %v2117_v2 = vld [vmem:[%s3098_s23 + $0x6c] sm:$0xf] }
 0x4fb   : >> { %2116 = vst [vmem:[%s3094_s18 + $0x68] sm:$0xf] %v2115_v40  ;;  %v2119_v1 = vld [vmem:[%s3098_s23 + $0x70] sm:$0xf]  ;;  %v2121_v53 = vld [vmem:[%s3098_s23 + $0x74] sm:$0xf] }
 0x4fc   : >> { %2118 = vst [vmem:[%s3094_s18 + $0x6c] sm:$0xf] %v2117_v2  ;;  %2120 = vst [vmem:[%s3094_s18 + $0x70] sm:$0xf] %v2119_v1  ;;  %v2123_v39 = vld [vmem:[%s3098_s23 + $0x78] sm:$0xf] }
 0x4fd   : >> { %2122 = vst [vmem:[%s3094_s18 + $0x74] sm:$0xf] %v2121_v53  ;;  %v2125_v33 = vld [vmem:[%s3098_s23 + $0x7c] sm:$0xf]  ;;  %2124 = vst [vmem:[%s3094_s18 + $0x78] sm:$0xf] %v2123_v39 }
 0x4fe   : >> { %2126 = vst [vmem:[%s3094_s18 + $0x7c] sm:$0xf] %v2125_v33  ;;  %s4511_s9 = smov (%p2128_p11, %s2127_s9), 0  ;;  %s2057_s8 = sadd.s32 1, %s3106_s8  }
 0x4ff   : >> { %s2447_s10 = sshll.u32 %s4511_s9, 7  ;;  %p2056_p12 = scmp.ge.s32.totalorder %s2057_s8, %s4374_s7 }
 0x500   : >> { %s2132_s23 = scalar_lea.vmem %s4259_s15, %s2447_s10 [#allocation2]   ;;  %s2133_s18 = scalar_lea.vmem %s4368_s5, %s2447_s10  }
 0x501   : >> { %s4504_s24 = smov %s4511_s9  ;;  %2059 = sbr.rel (!%p2056_p12) target bundleno = 1257 (0x4e9), region = 122 }
 0x506 PF: > { %s4478_s11 = sand.u32 31, %s4509_s26   ;;  %s2490_s12 = sshll.u32 %s4374_s7, 7 }
 0x507   : > { %s2138_s13 = scalar_lea.vmem %s4259_s15, %s2490_s12 [#allocation2]   ;;  %s2140_s14 = scalar_lea.vmem %s4368_s5, %s2490_s12  }
 0x508   : > { %p2452_p13 = scmp.le.s32.totalorder %s4478_s11, 0 }
 0x509   : > { %s3108_s17 = smov (!%p2452_p13), %s2140_s14   ;;  %s3112_s20 = smov (!%p2452_p13), %s2138_s13  }
 0x50a   : > { %2339 = sbr.rel (%p2452_p13) target bundleno = 1303 (0x517), region = 127  ;;  %s3116_s21 = smov (!%p2452_p13), 0  }
 0x50b   : > { %s3120_s29 = smov (!%p2452_p13), 0  }
 0x50f LB: >> { %v2150_v21 = vld [vmem:[%s3114_s20] sm:$0xf]  ;;  %s2152_s25 = sadd.s32 1, %s3118_s21  ;;  %s2144_s29 = sadd.s32 1, %s3122_s29   ;;  %s3122_s29 = sphi %s3120_s29, %s2144_s29   ;;  %s3118_s21 = sphi %s3116_s21, %s3117_s21   ;;  %s3114_s20 = sphi %s3112_s20, %s2157_s20   ;;  %s3110_s17 = sphi %s3108_s17, %s2158_s17  }
 0x510   : >> { %2151 = vst [vmem:[%s3110_s17] sm:$0xf] %v2150_v21  ;;  %p2153_p0 = scmp.ge.s32.totalorder %s2152_s25, %s4478_s11  ;;  %p2143_p1 = scmp.ge.s32.totalorder %s2144_s29, %s4478_s11 }
 0x512   : >> { %s4513_s25 = smov (%p2153_p0, %s2152_s25), 0  ;;  %2146 = sbr.rel (!%p2143_p1) target bundleno = 1295 (0x50f), region = 133 }
 0x513   : >> { %s2453_s15 = sshll.u32 %s4513_s25, 2  ;;  %s3117_s21 = smov %s4513_s25  }
 0x514   : >> { %s2157_s20 = scalar_lea.vmem %s2138_s13, %s2453_s15 [#allocation2]   ;;  %s2158_s17 = scalar_lea.vmem %s2140_s14, %s2453_s15  }
 0x517 PF: > { %p11_p2 = scmp.ge.s32.totalorder %s3165_s19, 4   ;;  %s4505_s15 = smov %s3086_s16 }
 0x518   : > { %s4506_s16 = smov %s3173_s22  ;;  %s4507_s17 = smov %s3165_s19 }
 0x519   :  { %13 = sbr.rel (!%p11_p2) target bundleno = 2 (0x2), region = 144 }

</bundles_post_ra>
